<compile_context>
chip_gen: v6e
topology: v6e:2x2x1
jax: 0.10.0
libtpu: 0.0.40
codegen_flags: <defaults>
</compile_context>

<pallas_src>
import numpy as np

import jax
import jax.numpy as jnp
from jax.experimental import pallas as pl
from jax.experimental.pallas import tpu as pltpu


# ----------------------------------------------------------------------------
# Model dimensions
# ----------------------------------------------------------------------------
LATENT_DIM = 128          # matches the PyTorch default latent_dim=128
METADATA_DIMS = 10
META_PAD = 128            # metadata zero-padded to a lane-dense width
META_EMB = 32
NUM_CLASSES = 3
CLS_PAD = 128             # class logits padded to a lane-dense width
IMG = 16                  # input image is [B, 1, 16, 16]

PARAM_ORDER = (
    "enc1_w", "enc1_b", "enc2_w", "enc2_b", "ench_w", "ench_b",
    "meta1_w", "meta1_b", "meta2_w", "meta2_b",
    "cls1_wz", "cls1_wm", "cls1_b", "cls2_w", "cls2_b", "cls3_w", "cls3_b",
    "decfc_w", "decfc_b", "dec1_w", "dec1_b", "dec2_w", "dec2_b",
)


# ----------------------------------------------------------------------------
# Init-time lowering of conv / upsample to dense linear operators
# (exact: convolution and nearest-neighbour upsampling are linear maps)
# ----------------------------------------------------------------------------
def _np_conv_dense(w, H, W, stride, pad):
    """w: [KH, KW, Cin, Cout] -> dense [H*W*Cin, OH*OW*Cout] acting on
    HWC-flattened feature maps (zero padding folded in)."""
    KH, KW, Cin, Cout = w.shape
    OH = (H + 2 * pad - KH) // stride + 1
    OW = (W + 2 * pad - KW) // stride + 1
    M = np.zeros((H * W * Cin, OH * OW * Cout), np.float32)
    for ho in range(OH):
        for wo in range(OW):
            ocol = (ho * OW + wo) * Cout
            for kh in range(KH):
                hi = ho * stride - pad + kh
                if hi < 0 or hi >= H:
                    continue
                for kw in range(KW):
                    wi = wo * stride - pad + kw
                    if wi < 0 or wi >= W:
                        continue
                    irow = (hi * W + wi) * Cin
                    M[irow:irow + Cin, ocol:ocol + Cout] += w[kh, kw]
    return M


def _np_upsample2x_dense(H, W, C):
    """Nearest-neighbour 2x upsample as dense [H*W*C, (2H)*(2W)*C]."""
    U = np.zeros((H * W * C, (2 * H) * (2 * W) * C), np.float32)
    for ho in range(2 * H):
        hi = ho // 2
        for wo in range(2 * W):
            wi = wo // 2
            base_in = (hi * W + wi) * C
            base_out = (ho * (2 * W) + wo) * C
            for c in range(C):
                U[base_in + c, base_out + c] = 1.0
    return U


# ----------------------------------------------------------------------------
# Parameter construction (deterministic, synthetic stand-in for Encoder/Decoder)
# NOTE: importing real PyTorch conv weights would require permuting
# [Cout, Cin, KH, KW] -> [KH, KW, Cin, Cout] before _np_conv_dense.
# ----------------------------------------------------------------------------
def init_params(key):
    kit = iter(jax.random.split(key, 32))

    def nrm(shape, scale=0.05):
        return np.asarray(jax.random.normal(next(kit), shape, jnp.float32)) * scale

    p = {}

    def put(name, w_np, b_np):
        p[name + "_w"] = jnp.asarray(w_np, jnp.bfloat16)                  # MXU input
        p[name + "_b"] = jnp.asarray(b_np, jnp.float32).reshape(1, -1)    # f32 bias

    # ---- Encoder: conv(1->8, k3, s2, p1) ReLU, conv(8->16, k3, s2, p1) ReLU,
    #               fc_mu / fc_logvar on the flattened 4x4x16 feature map.
    w, b = nrm((3, 3, 1, 8)), nrm((8,))
    put("enc1", _np_conv_dense(w, IMG, IMG, 2, 1), np.tile(b, 8 * 8))        # [256,512]
    w, b = nrm((3, 3, 8, 16)), nrm((16,))
    put("enc2", _np_conv_dense(w, 8, 8, 2, 1), np.tile(b, 4 * 4))            # [512,256]
    wmu, bmu = nrm((4 * 4 * 16, LATENT_DIM)), nrm((LATENT_DIM,))
    wlv, blv = nrm((4 * 4 * 16, LATENT_DIM)), nrm((LATENT_DIM,))
    put("ench", np.concatenate([wmu, wlv], axis=1),                          # fused head
        np.concatenate([bmu, blv], axis=0))                                  # [256,256]

    # ---- MetadataEncoder: Linear(10,128) ReLU (Dropout=id) Linear(128,32) ReLU
    w, b = nrm((METADATA_DIMS, 128)), nrm((128,))
    w_pad = np.zeros((META_PAD, 128), np.float32)
    w_pad[:METADATA_DIMS] = w                                                # zero rows for lane padding
    put("meta1", w_pad, b)
    w, b = nrm((128, META_EMB)), nrm((META_EMB,))
    put("meta2", w, b)

    # ---- Classifier: Linear(latent+32,256) ReLU Linear(256,128) ReLU Linear(128,3)
    w, b = nrm((LATENT_DIM + META_EMB, 256)), nrm((256,))
    p["cls1_wz"] = jnp.asarray(w[:LATENT_DIM], jnp.bfloat16)                 # concat folded
    p["cls1_wm"] = jnp.asarray(w[LATENT_DIM:], jnp.bfloat16)                 # into two GEMMs
    p["cls1_b"] = jnp.asarray(b, jnp.float32).reshape(1, -1)
    w, b = nrm((256, 128)), nrm((128,))
    put("cls2", w, b)
    w, b = nrm((128, NUM_CLASSES)), nrm((NUM_CLASSES,))
    w_pad = np.zeros((128, CLS_PAD), np.float32)
    w_pad[:, :NUM_CLASSES] = w                                               # lane-dense logits
    b_pad = np.zeros((CLS_PAD,), np.float32)
    b_pad[:NUM_CLASSES] = b
    put("cls3", w_pad, b_pad)

    # ---- Decoder: fc(latent->4*4*16) ReLU, up2x+conv(16->8) ReLU, up2x+conv(8->1) Sigmoid
    w, b = nrm((LATENT_DIM, 4 * 4 * 16)), nrm((4 * 4 * 16,))
    put("decfc", w, b)
    w, b = nrm((3, 3, 16, 8)), nrm((8,))
    put("dec1", _np_upsample2x_dense(4, 4, 16) @ _np_conv_dense(w, 8, 8, 1, 1),
        np.tile(b, 8 * 8))                                                   # [256,512]
    w, b = nrm((3, 3, 8, 1)), nrm((1,))
    put("dec2", _np_upsample2x_dense(8, 8, 8) @ _np_conv_dense(w, IMG, IMG, 1, 1),
        np.tile(b, IMG * IMG))                                               # [512,256]
    return p


# ----------------------------------------------------------------------------
# The single fused Pallas kernel
# ----------------------------------------------------------------------------
def _fused_vae_kernel(x_ref, meta_ref, *rest):
    n = len(PARAM_ORDER)
    prm = dict(zip(PARAM_ORDER, rest[:n]))
    recon_ref, cls_ref, mulv_ref = rest[n:]

    def dense(a, name, act="none"):
        # bf16 MXU inputs, f32 accumulate, f32 bias/activation.
        y = jnp.dot(a.astype(jnp.bfloat16), prm[name + "_w"][...],
                    preferred_element_type=jnp.float32)
        y = y + prm[name + "_b"][...]
        if act == "relu":
            y = jnp.maximum(y, 0.0)
        elif act == "sigmoid":
            y = 1.0 / (1.0 + jnp.exp(-y))
        return y

    x = x_ref[...]          # [B, 256] f32 (flattened 16x16x1 image)
    m = meta_ref[...]       # [B, 128] f32 (metadata zero-padded to 128 lanes)

    # ---- Encoder (convs pre-lowered to dense matrices over HWC-flattened maps)
    h = dense(x, "enc1", "relu")          # [B, 512]  (8x8x8)
    h = dense(h, "enc2", "relu")          # [B, 256]  (4x4x16)
    mulv = dense(h, "ench")               # [B, 256]  = mu || logvar
    z = mulv[:, :LATENT_DIM]              # eval-mode reparameterize: z = mu

    # ---- Metadata encoder (Dropout = identity in eval mode)
    me = dense(m, "meta1", "relu")        # [B, 128]
    me = dense(me, "meta2", "relu")       # [B, 32]

    # ---- Classifier: cat([z, me]) @ W1  ==  z @ W1z + me @ W1m
    c = (jnp.dot(z.astype(jnp.bfloat16), prm["cls1_wz"][...],
                 preferred_element_type=jnp.float32)
         + jnp.dot(me.astype(jnp.bfloat16), prm["cls1_wm"][...],
                   preferred_element_type=jnp.float32)
         + prm["cls1_b"][...])
    c = jnp.maximum(c, 0.0)
    c = dense(c, "cls2", "relu")          # [B, 128]
    cls = dense(c, "cls3")                # [B, 128] (first NUM_CLASSES valid)

    # ---- Decoder (upsample+conv fused into dense matrices)
    d = dense(z, "decfc", "relu")         # [B, 256]  (4x4x16)
    d = dense(d, "dec1", "relu")          # [B, 512]  (8x8x8)
    d = dense(d, "dec2", "sigmoid")       # [B, 256]  (16x16x1)

    recon_ref[...] = d
    cls_ref[...] = cls
    mulv_ref[...] = mulv


# ----------------------------------------------------------------------------
# Wrapper
# ----------------------------------------------------------------------------
def supervised_vae_forward(params, x_nchw, metadata):
    B = x_nchw.shape[0]
    x_flat = x_nchw.reshape(B, -1).astype(jnp.float32)                    # [B, 256]
    meta_pad = jnp.zeros((B, META_PAD), jnp.float32)
    meta_pad = meta_pad.at[:, :METADATA_DIMS].set(metadata.astype(jnp.float32))

    flat_params = [params[name] for name in PARAM_ORDER]
    vmem = pl.BlockSpec(memory_space=pltpu.MemorySpace.VMEM)

    recon_flat, cls_pad, mulv = pl.pallas_call(
        _fused_vae_kernel,
        out_shape=(
            jax.ShapeDtypeStruct((B, IMG * IMG), jnp.float32),            # recon (flat)
            jax.ShapeDtypeStruct((B, CLS_PAD), jnp.float32),              # padded logits
            jax.ShapeDtypeStruct((B, 2 * LATENT_DIM), jnp.float32),       # mu || logvar
        ),
        in_specs=[vmem] * (2 + len(flat_params)),
        out_specs=(vmem, vmem, vmem),
    )(x_flat, meta_pad, *flat_params)

    reconstruction = recon_flat.reshape(B, 1, IMG, IMG)                   # C=1 -> NCHW
    classification = cls_pad[:, :NUM_CLASSES]
    mu = mulv[:, :LATENT_DIM]
    logvar = mulv[:, LATENT_DIM:]
    return reconstruction, classification, mu, logvar


# ----------------------------------------------------------------------------
# Pure-JAX reference (same math, f32 GEMMs) for a correctness sanity check
# ----------------------------------------------------------------------------
def _reference_forward(params, x_nchw, metadata):
    B = x_nchw.shape[0]
    x = x_nchw.reshape(B, -1).astype(jnp.float32)
    m = jnp.zeros((B, META_PAD), jnp.float32).at[:, :METADATA_DIMS].set(metadata)

    def dense(a, name, act="none"):
        y = a @ params[name + "_w"].astype(jnp.float32) + params[name + "_b"]
        if act == "relu":
            y = jnp.maximum(y, 0.0)
        elif act == "sigmoid":
            y = 1.0 / (1.0 + jnp.exp(-y))
        return y

    h = dense(x, "enc1", "relu")
    h = dense(h, "enc2", "relu")
    mulv = dense(h, "ench")
    z = mulv[:, :LATENT_DIM]
    me = dense(m, "meta1", "relu")
    me = dense(me, "meta2", "relu")
    c = (z @ params["cls1_wz"].astype(jnp.float32)
         + me @ params["cls1_wm"].astype(jnp.float32) + params["cls1_b"])
    c = jnp.maximum(c, 0.0)
    c = dense(c, "cls2", "relu")
    cls = dense(c, "cls3")
    d = dense(z, "decfc", "relu")
    d = dense(d, "dec1", "relu")
    d = dense(d, "dec2", "sigmoid")
    return (d.reshape(B, 1, IMG, IMG), cls[:, :NUM_CLASSES],
            mulv[:, :LATENT_DIM], mulv[:, LATENT_DIM:])


if __name__ == "__main__":
    key = jax.random.PRNGKey(0)
    kp, kx, km = jax.random.split(key, 3)

    params = init_params(kp)
    x = jax.random.normal(kx, (2, 1, IMG, IMG), jnp.float32)       # NCHW image
    metadata = jax.random.normal(km, (2, METADATA_DIMS), jnp.float32)

    fwd = jax.jit(supervised_vae_forward)
    recon, cls, mu, logvar = fwd(params, x, metadata)
    jax.block_until_ready((recon, cls, mu, logvar))

    assert recon.shape == (2, 1, IMG, IMG)
    assert cls.shape == (2, NUM_CLASSES)
    assert mu.shape == (2, LATENT_DIM)
    assert logvar.shape == (2, LATENT_DIM)

    # Sanity check against a plain-JAX reference (bf16-vs-f32 activation cast
    # is the only difference -> generous tolerance).
    ref = _reference_forward(params, x, metadata)
    for got, want in zip((recon, cls, mu, logvar), ref):
        assert got.shape == want.shape
        assert bool(jnp.max(jnp.abs(got - want)) < 2e-2)

    print("KERNEL_OK")
</pallas_src>

<mosaic_0001>
module attributes {stable_mosaic.version = 11 : i64} {
  func.func @_fused_vae_kernel(%arg0: memref<2x256xf32, #tpu.memory_space<vmem>>, %arg1: memref<2x128xf32, #tpu.memory_space<vmem>>, %arg2: memref<256x512xbf16, #tpu.memory_space<vmem>>, %arg3: memref<1x512xf32, #tpu.memory_space<vmem>>, %arg4: memref<512x256xbf16, #tpu.memory_space<vmem>>, %arg5: memref<1x256xf32, #tpu.memory_space<vmem>>, %arg6: memref<256x256xbf16, #tpu.memory_space<vmem>>, %arg7: memref<1x256xf32, #tpu.memory_space<vmem>>, %arg8: memref<128x128xbf16, #tpu.memory_space<vmem>>, %arg9: memref<1x128xf32, #tpu.memory_space<vmem>>, %arg10: memref<128x32xbf16, #tpu.memory_space<vmem>>, %arg11: memref<1x32xf32, #tpu.memory_space<vmem>>, %arg12: memref<128x256xbf16, #tpu.memory_space<vmem>>, %arg13: memref<32x256xbf16, #tpu.memory_space<vmem>>, %arg14: memref<1x256xf32, #tpu.memory_space<vmem>>, %arg15: memref<256x128xbf16, #tpu.memory_space<vmem>>, %arg16: memref<1x128xf32, #tpu.memory_space<vmem>>, %arg17: memref<128x128xbf16, #tpu.memory_space<vmem>>, %arg18: memref<1x128xf32, #tpu.memory_space<vmem>>, %arg19: memref<128x256xbf16, #tpu.memory_space<vmem>>, %arg20: memref<1x256xf32, #tpu.memory_space<vmem>>, %arg21: memref<256x512xbf16, #tpu.memory_space<vmem>>, %arg22: memref<1x512xf32, #tpu.memory_space<vmem>>, %arg23: memref<512x256xbf16, #tpu.memory_space<vmem>>, %arg24: memref<1x256xf32, #tpu.memory_space<vmem>>, %arg25: memref<2x256xf32, #tpu.memory_space<vmem>>, %arg26: memref<2x128xf32, #tpu.memory_space<vmem>>, %arg27: memref<2x256xf32, #tpu.memory_space<vmem>>) attributes {dimension_semantics = [], scalar_prefetch = 0 : i64, scratch_operands = 0 : i64, tpu.core_type = #tpu.core_type<tc>} {
    %c0 = arith.constant 0 : index
    %c0_0 = arith.constant 0 : index
    %0 = vector.load %arg0[%c0, %c0_0] : memref<2x256xf32, #tpu.memory_space<vmem>>, vector<2x256xf32>
    %c0_1 = arith.constant 0 : index
    %c0_2 = arith.constant 0 : index
    %1 = vector.load %arg1[%c0_1, %c0_2] : memref<2x128xf32, #tpu.memory_space<vmem>>, vector<2x128xf32>
    %2 = arith.truncf %0 : vector<2x256xf32> to vector<2x256xbf16>
    %c0_3 = arith.constant 0 : index
    %c0_4 = arith.constant 0 : index
    %3 = vector.load %arg2[%c0_3, %c0_4] : memref<256x512xbf16, #tpu.memory_space<vmem>>, vector<256x512xbf16>
    %cst = arith.constant dense<0.000000e+00> : vector<2x512xf32>
    %4 = tpu.matmul %2, %3, %cst {dimension_numbers = #tpu.dot_dimension_numbers<[1], [0], [0], [1], [0, 0, 1, 1], [], []>} : vector<2x256xbf16>, vector<256x512xbf16>, vector<2x512xf32> -> vector<2x512xf32>
    %c0_5 = arith.constant 0 : index
    %c0_6 = arith.constant 0 : index
    %5 = vector.load %arg3[%c0_5, %c0_6] : memref<1x512xf32, #tpu.memory_space<vmem>>, vector<1x512xf32>
    %6 = vector.broadcast %5 : vector<1x512xf32> to vector<2x512xf32>
    %7 = arith.addf %4, %6 : vector<2x512xf32>
    %cst_7 = arith.constant 0.000000e+00 : f32
    %8 = vector.broadcast %cst_7 : f32 to vector<2x512xf32>
    %9 = arith.maximumf %7, %8 : vector<2x512xf32>
    %10 = arith.truncf %9 : vector<2x512xf32> to vector<2x512xbf16>
    %c0_8 = arith.constant 0 : index
    %c0_9 = arith.constant 0 : index
    %11 = vector.load %arg4[%c0_8, %c0_9] : memref<512x256xbf16, #tpu.memory_space<vmem>>, vector<512x256xbf16>
    %cst_10 = arith.constant dense<0.000000e+00> : vector<2x256xf32>
    %12 = tpu.matmul %10, %11, %cst_10 {dimension_numbers = #tpu.dot_dimension_numbers<[1], [0], [0], [1], [0, 0, 1, 1], [], []>} : vector<2x512xbf16>, vector<512x256xbf16>, vector<2x256xf32> -> vector<2x256xf32>
    %c0_11 = arith.constant 0 : index
    %c0_12 = arith.constant 0 : index
    %13 = vector.load %arg5[%c0_11, %c0_12] : memref<1x256xf32, #tpu.memory_space<vmem>>, vector<1x256xf32>
    %14 = vector.broadcast %13 : vector<1x256xf32> to vector<2x256xf32>
    %15 = arith.addf %12, %14 : vector<2x256xf32>
    %cst_13 = arith.constant 0.000000e+00 : f32
    %16 = vector.broadcast %cst_13 : f32 to vector<2x256xf32>
    %17 = arith.maximumf %15, %16 : vector<2x256xf32>
    %18 = arith.truncf %17 : vector<2x256xf32> to vector<2x256xbf16>
    %c0_14 = arith.constant 0 : index
    %c0_15 = arith.constant 0 : index
    %19 = vector.load %arg6[%c0_14, %c0_15] : memref<256x256xbf16, #tpu.memory_space<vmem>>, vector<256x256xbf16>
    %cst_16 = arith.constant dense<0.000000e+00> : vector<2x256xf32>
    %20 = tpu.matmul %18, %19, %cst_16 {dimension_numbers = #tpu.dot_dimension_numbers<[1], [0], [0], [1], [0, 0, 1, 1], [], []>} : vector<2x256xbf16>, vector<256x256xbf16>, vector<2x256xf32> -> vector<2x256xf32>
    %c0_17 = arith.constant 0 : index
    %c0_18 = arith.constant 0 : index
    %21 = vector.load %arg7[%c0_17, %c0_18] : memref<1x256xf32, #tpu.memory_space<vmem>>, vector<1x256xf32>
    %22 = vector.broadcast %21 : vector<1x256xf32> to vector<2x256xf32>
    %23 = arith.addf %20, %22 : vector<2x256xf32>
    %24 = vector.extract_strided_slice %23 {offsets = [0, 0], sizes = [2, 128], strides = [1, 1]} : vector<2x256xf32> to vector<2x128xf32>
    %25 = arith.truncf %1 : vector<2x128xf32> to vector<2x128xbf16>
    %c0_19 = arith.constant 0 : index
    %c0_20 = arith.constant 0 : index
    %26 = vector.load %arg8[%c0_19, %c0_20] : memref<128x128xbf16, #tpu.memory_space<vmem>>, vector<128x128xbf16>
    %cst_21 = arith.constant dense<0.000000e+00> : vector<2x128xf32>
    %27 = tpu.matmul %25, %26, %cst_21 {dimension_numbers = #tpu.dot_dimension_numbers<[1], [0], [0], [1], [0, 0, 1, 1], [], []>} : vector<2x128xbf16>, vector<128x128xbf16>, vector<2x128xf32> -> vector<2x128xf32>
    %c0_22 = arith.constant 0 : index
    %c0_23 = arith.constant 0 : index
    %28 = vector.load %arg9[%c0_22, %c0_23] : memref<1x128xf32, #tpu.memory_space<vmem>>, vector<1x128xf32>
    %29 = vector.broadcast %28 : vector<1x128xf32> to vector<2x128xf32>
    %30 = arith.addf %27, %29 : vector<2x128xf32>
    %cst_24 = arith.constant 0.000000e+00 : f32
    %31 = vector.broadcast %cst_24 : f32 to vector<2x128xf32>
    %32 = arith.maximumf %30, %31 : vector<2x128xf32>
    %33 = arith.truncf %32 : vector<2x128xf32> to vector<2x128xbf16>
    %c0_25 = arith.constant 0 : index
    %c0_26 = arith.constant 0 : index
    %34 = vector.load %arg10[%c0_25, %c0_26] : memref<128x32xbf16, #tpu.memory_space<vmem>>, vector<128x32xbf16>
    %cst_27 = arith.constant dense<0.000000e+00> : vector<2x32xf32>
    %35 = tpu.matmul %33, %34, %cst_27 {dimension_numbers = #tpu.dot_dimension_numbers<[1], [0], [0], [1], [0, 0, 1, 1], [], []>} : vector<2x128xbf16>, vector<128x32xbf16>, vector<2x32xf32> -> vector<2x32xf32>
    %c0_28 = arith.constant 0 : index
    %c0_29 = arith.constant 0 : index
    %36 = vector.load %arg11[%c0_28, %c0_29] : memref<1x32xf32, #tpu.memory_space<vmem>>, vector<1x32xf32>
    %37 = vector.broadcast %36 : vector<1x32xf32> to vector<2x32xf32>
    %38 = arith.addf %35, %37 : vector<2x32xf32>
    %cst_30 = arith.constant 0.000000e+00 : f32
    %39 = vector.broadcast %cst_30 : f32 to vector<2x32xf32>
    %40 = arith.maximumf %38, %39 : vector<2x32xf32>
    %41 = arith.truncf %24 : vector<2x128xf32> to vector<2x128xbf16>
    %c0_31 = arith.constant 0 : index
    %c0_32 = arith.constant 0 : index
    %42 = vector.load %arg12[%c0_31, %c0_32] : memref<128x256xbf16, #tpu.memory_space<vmem>>, vector<128x256xbf16>
    %cst_33 = arith.constant dense<0.000000e+00> : vector<2x256xf32>
    %43 = tpu.matmul %41, %42, %cst_33 {dimension_numbers = #tpu.dot_dimension_numbers<[1], [0], [0], [1], [0, 0, 1, 1], [], []>} : vector<2x128xbf16>, vector<128x256xbf16>, vector<2x256xf32> -> vector<2x256xf32>
    %44 = arith.truncf %40 : vector<2x32xf32> to vector<2x32xbf16>
    %c0_34 = arith.constant 0 : index
    %c0_35 = arith.constant 0 : index
    %45 = vector.load %arg13[%c0_34, %c0_35] : memref<32x256xbf16, #tpu.memory_space<vmem>>, vector<32x256xbf16>
    %cst_36 = arith.constant dense<0.000000e+00> : vector<2x256xf32>
    %46 = tpu.matmul %44, %45, %cst_36 {dimension_numbers = #tpu.dot_dimension_numbers<[1], [0], [0], [1], [0, 0, 1, 1], [], []>} : vector<2x32xbf16>, vector<32x256xbf16>, vector<2x256xf32> -> vector<2x256xf32>
    %47 = arith.addf %43, %46 : vector<2x256xf32>
    %c0_37 = arith.constant 0 : index
    %c0_38 = arith.constant 0 : index
    %48 = vector.load %arg14[%c0_37, %c0_38] : memref<1x256xf32, #tpu.memory_space<vmem>>, vector<1x256xf32>
    %49 = vector.broadcast %48 : vector<1x256xf32> to vector<2x256xf32>
    %50 = arith.addf %47, %49 : vector<2x256xf32>
    %cst_39 = arith.constant 0.000000e+00 : f32
    %51 = vector.broadcast %cst_39 : f32 to vector<2x256xf32>
    %52 = arith.maximumf %50, %51 : vector<2x256xf32>
    %53 = arith.truncf %52 : vector<2x256xf32> to vector<2x256xbf16>
    %c0_40 = arith.constant 0 : index
    %c0_41 = arith.constant 0 : index
    %54 = vector.load %arg15[%c0_40, %c0_41] : memref<256x128xbf16, #tpu.memory_space<vmem>>, vector<256x128xbf16>
    %cst_42 = arith.constant dense<0.000000e+00> : vector<2x128xf32>
    %55 = tpu.matmul %53, %54, %cst_42 {dimension_numbers = #tpu.dot_dimension_numbers<[1], [0], [0], [1], [0, 0, 1, 1], [], []>} : vector<2x256xbf16>, vector<256x128xbf16>, vector<2x128xf32> -> vector<2x128xf32>
    %c0_43 = arith.constant 0 : index
    %c0_44 = arith.constant 0 : index
    %56 = vector.load %arg16[%c0_43, %c0_44] : memref<1x128xf32, #tpu.memory_space<vmem>>, vector<1x128xf32>
    %57 = vector.broadcast %56 : vector<1x128xf32> to vector<2x128xf32>
    %58 = arith.addf %55, %57 : vector<2x128xf32>
    %cst_45 = arith.constant 0.000000e+00 : f32
    %59 = vector.broadcast %cst_45 : f32 to vector<2x128xf32>
    %60 = arith.maximumf %58, %59 : vector<2x128xf32>
    %61 = arith.truncf %60 : vector<2x128xf32> to vector<2x128xbf16>
    %c0_46 = arith.constant 0 : index
    %c0_47 = arith.constant 0 : index
    %62 = vector.load %arg17[%c0_46, %c0_47] : memref<128x128xbf16, #tpu.memory_space<vmem>>, vector<128x128xbf16>
    %cst_48 = arith.constant dense<0.000000e+00> : vector<2x128xf32>
    %63 = tpu.matmul %61, %62, %cst_48 {dimension_numbers = #tpu.dot_dimension_numbers<[1], [0], [0], [1], [0, 0, 1, 1], [], []>} : vector<2x128xbf16>, vector<128x128xbf16>, vector<2x128xf32> -> vector<2x128xf32>
    %c0_49 = arith.constant 0 : index
    %c0_50 = arith.constant 0 : index
    %64 = vector.load %arg18[%c0_49, %c0_50] : memref<1x128xf32, #tpu.memory_space<vmem>>, vector<1x128xf32>
    %65 = vector.broadcast %64 : vector<1x128xf32> to vector<2x128xf32>
    %66 = arith.addf %63, %65 : vector<2x128xf32>
    %67 = arith.truncf %24 : vector<2x128xf32> to vector<2x128xbf16>
    %c0_51 = arith.constant 0 : index
    %c0_52 = arith.constant 0 : index
    %68 = vector.load %arg19[%c0_51, %c0_52] : memref<128x256xbf16, #tpu.memory_space<vmem>>, vector<128x256xbf16>
    %cst_53 = arith.constant dense<0.000000e+00> : vector<2x256xf32>
    %69 = tpu.matmul %67, %68, %cst_53 {dimension_numbers = #tpu.dot_dimension_numbers<[1], [0], [0], [1], [0, 0, 1, 1], [], []>} : vector<2x128xbf16>, vector<128x256xbf16>, vector<2x256xf32> -> vector<2x256xf32>
    %c0_54 = arith.constant 0 : index
    %c0_55 = arith.constant 0 : index
    %70 = vector.load %arg20[%c0_54, %c0_55] : memref<1x256xf32, #tpu.memory_space<vmem>>, vector<1x256xf32>
    %71 = vector.broadcast %70 : vector<1x256xf32> to vector<2x256xf32>
    %72 = arith.addf %69, %71 : vector<2x256xf32>
    %cst_56 = arith.constant 0.000000e+00 : f32
    %73 = vector.broadcast %cst_56 : f32 to vector<2x256xf32>
    %74 = arith.maximumf %72, %73 : vector<2x256xf32>
    %75 = arith.truncf %74 : vector<2x256xf32> to vector<2x256xbf16>
    %c0_57 = arith.constant 0 : index
    %c0_58 = arith.constant 0 : index
    %76 = vector.load %arg21[%c0_57, %c0_58] : memref<256x512xbf16, #tpu.memory_space<vmem>>, vector<256x512xbf16>
    %cst_59 = arith.constant dense<0.000000e+00> : vector<2x512xf32>
    %77 = tpu.matmul %75, %76, %cst_59 {dimension_numbers = #tpu.dot_dimension_numbers<[1], [0], [0], [1], [0, 0, 1, 1], [], []>} : vector<2x256xbf16>, vector<256x512xbf16>, vector<2x512xf32> -> vector<2x512xf32>
    %c0_60 = arith.constant 0 : index
    %c0_61 = arith.constant 0 : index
    %78 = vector.load %arg22[%c0_60, %c0_61] : memref<1x512xf32, #tpu.memory_space<vmem>>, vector<1x512xf32>
    %79 = vector.broadcast %78 : vector<1x512xf32> to vector<2x512xf32>
    %80 = arith.addf %77, %79 : vector<2x512xf32>
    %cst_62 = arith.constant 0.000000e+00 : f32
    %81 = vector.broadcast %cst_62 : f32 to vector<2x512xf32>
    %82 = arith.maximumf %80, %81 : vector<2x512xf32>
    %83 = arith.truncf %82 : vector<2x512xf32> to vector<2x512xbf16>
    %c0_63 = arith.constant 0 : index
    %c0_64 = arith.constant 0 : index
    %84 = vector.load %arg23[%c0_63, %c0_64] : memref<512x256xbf16, #tpu.memory_space<vmem>>, vector<512x256xbf16>
    %cst_65 = arith.constant dense<0.000000e+00> : vector<2x256xf32>
    %85 = tpu.matmul %83, %84, %cst_65 {dimension_numbers = #tpu.dot_dimension_numbers<[1], [0], [0], [1], [0, 0, 1, 1], [], []>} : vector<2x512xbf16>, vector<512x256xbf16>, vector<2x256xf32> -> vector<2x256xf32>
    %c0_66 = arith.constant 0 : index
    %c0_67 = arith.constant 0 : index
    %86 = vector.load %arg24[%c0_66, %c0_67] : memref<1x256xf32, #tpu.memory_space<vmem>>, vector<1x256xf32>
    %87 = vector.broadcast %86 : vector<1x256xf32> to vector<2x256xf32>
    %88 = arith.addf %85, %87 : vector<2x256xf32>
    %cst_68 = arith.constant 0.000000e+00 : f32
    %89 = vector.broadcast %cst_68 : f32 to vector<2x256xf32>
    %90 = arith.subf %89, %88 : vector<2x256xf32>
    %91 = math.exp %90 : vector<2x256xf32>
    %cst_69 = arith.constant 1.000000e+00 : f32
    %92 = vector.broadcast %cst_69 : f32 to vector<2x256xf32>
    %93 = arith.addf %92, %91 : vector<2x256xf32>
    %cst_70 = arith.constant 1.000000e+00 : f32
    %94 = vector.broadcast %cst_70 : f32 to vector<2x256xf32>
    %95 = arith.divf %94, %93 : vector<2x256xf32>
    %c0_71 = arith.constant 0 : index
    %c0_72 = arith.constant 0 : index
    %96 = vector.load %arg25[%c0_71, %c0_72] : memref<2x256xf32, #tpu.memory_space<vmem>>, vector<2x256xf32>
    tpu.vector_store %arg25[%c0_71, %c0_72], %95 {strides = array<i32>} : memref<2x256xf32, #tpu.memory_space<vmem>>, vector<2x256xf32>,
    %c0_73 = arith.constant 0 : index
    %c0_74 = arith.constant 0 : index
    %97 = vector.load %arg26[%c0_73, %c0_74] : memref<2x128xf32, #tpu.memory_space<vmem>>, vector<2x128xf32>
    tpu.vector_store %arg26[%c0_73, %c0_74], %66 {strides = array<i32>} : memref<2x128xf32, #tpu.memory_space<vmem>>, vector<2x128xf32>,
    %c0_75 = arith.constant 0 : index
    %c0_76 = arith.constant 0 : index
    %98 = vector.load %arg27[%c0_75, %c0_76] : memref<2x256xf32, #tpu.memory_space<vmem>>, vector<2x256xf32>
    tpu.vector_store %arg27[%c0_75, %c0_76], %23 {strides = array<i32>} : memref<2x256xf32, #tpu.memory_space<vmem>>, vector<2x256xf32>,
    return
  }
}

</mosaic_0001>

<bundles_post_ra>
// kernel: supervised_vae_forward.1
= control target key start
LH: loop header
LB: loop body
LE: loop exit
PB: predicated region body
PF: predicated region fallthrough
CT: control target
= control target key end

     0   :  { %s5343_s0 = inlined_call_operand.vmem [shape: f32[2,256], index: 0, kind: input, shape index: {}]   ;;  %s5344_s1 = inlined_call_operand.vmem [shape: f32[2,128], index: 1, kind: input, shape index: {}]   ;;  %s5345_s2 = inlined_call_operand.hbm [shape: bf16[256,512], index: 2, kind: input, shape index: {}]   ;;  %s5346_s3 = inlined_call_operand.vmem [shape: f32[1,512], index: 3, kind: input, shape index: {}]   ;;  %s5347_s4 = inlined_call_operand.hbm [shape: bf16[512,256], index: 4, kind: input, shape index: {}]   ;;  %s5348_s5 = inlined_call_operand.hbm [shape: f32[1,256], index: 5, kind: input, shape index: {}]   ;;  %s5349_s6 = inlined_call_operand.hbm [shape: bf16[256,256], index: 6, kind: input, shape index: {}]   ;;  %s5350_s7 = inlined_call_operand.hbm [shape: f32[1,256], index: 7, kind: input, shape index: {}]   ;;  %s5351_s8 = inlined_call_operand.hbm [shape: bf16[128,128], index: 8, kind: input, shape index: {}]   ;;  %s5352_s9 = inlined_call_operand.vmem [shape: f32[1,128], index: 9, kind: input, shape index: {}]   ;;  %s5353_s10 = inlined_call_operand.vmem [shape: bf16[128,32], index: 10, kind: input, shape index: {}]   ;;  %s5354_s11 = inlined_call_operand.hbm [shape: f32[1,32], index: 11, kind: input, shape index: {}]   ;;  %s5355_s12 = inlined_call_operand.vmem [shape: bf16[128,256], index: 12, kind: input, shape index: {}]   ;;  %s5356_s13 = inlined_call_operand.hbm [shape: bf16[32,256], index: 13, kind: input, shape index: {}]   ;;  %s5357_s14 = inlined_call_operand.hbm [shape: f32[1,256], index: 14, kind: input, shape index: {}]   ;;  %s5358_s15 = inlined_call_operand.hbm [shape: bf16[256,128], index: 15, kind: input, shape index: {}]   ;;  %s5359_s16 = inlined_call_operand.hbm [shape: f32[1,128], index: 16, kind: input, shape index: {}]   ;;  %s5360_s17 = inlined_call_operand.hbm [shape: bf16[128,128], index: 17, kind: input, shape index: {}]   ;;  %s5361_s18 = inlined_call_operand.hbm [shape: f32[1,128], index: 18, kind: input, shape index: {}]   ;;  %s5362_s19 = inlined_call_operand.hbm [shape: bf16[128,256], index: 19, kind: input, shape index: {}]   ;;  %s5363_s20 = inlined_call_operand.hbm [shape: f32[1,256], index: 20, kind: input, shape index: {}]   ;;  %s5364_s21 = inlined_call_operand.hbm [shape: bf16[256,512], index: 21, kind: input, shape index: {}]   ;;  %s5365_s22 = inlined_call_operand.vmem [shape: f32[1,512], index: 22, kind: input, shape index: {}]   ;;  %s5366_s23 = inlined_call_operand.hbm [shape: bf16[512,256], index: 23, kind: input, shape index: {}]   ;;  %s5367_s24 = inlined_call_operand.hbm [shape: f32[1,256], index: 24, kind: input, shape index: {}]   ;;  %s5368_s25 = inlined_call_operand.vmem [shape: f32[2,256], index: 25, kind: output, shape index: {0}]   ;;  %s5369_s26 = inlined_call_operand.hbm [shape: f32[2,128], index: 26, kind: output, shape index: {1}]   ;;  %s5370_s27 = inlined_call_operand.vmem [shape: f32[2,256], index: 27, kind: output, shape index: {2}]  }
   0x1   :  { %5372 = sst [smem:[#allocation43_spill]] %s5343_s0 }
   0x2   :  { %5373 = sst [smem:[#allocation44_spill]] %s5344_s1 }
   0x3   :  { %5374 = sst [smem:[#allocation45_spill]] %s5345_s2 }
   0x4   :  { %5375 = sst [smem:[#allocation46_spill]] %s5346_s3 }
   0x5   :  { %5376 = sst [smem:[#allocation47_spill]] %s5347_s4 }
   0x6   :  { %5377 = sst [smem:[#allocation48_spill]] %s5348_s5 }
   0x7   :  { %5378 = sst [smem:[#allocation49_spill]] %s5349_s6 }
   0x8   :  { %5379 = sst [smem:[#allocation50_spill]] %s5350_s7 }
   0x9   :  { %5380 = sst [smem:[#allocation51_spill]] %s5351_s8 }
   0xa   :  { %5381 = sst [smem:[#allocation52_spill]] %s5352_s9 }
   0xb   :  { %5382 = sst [smem:[#allocation53_spill]] %s5353_s10 }
   0xc   :  { %5383 = sst [smem:[#allocation54_spill]] %s5354_s11 }
   0xd   :  { %33 = vsyncpa [#allocation3], 0 }
   0xe   :  { %34 = vsyncpa [#allocation6], 0 }
   0xf   :  { %35 = vsyncpa [#allocation9], 0 }
  0x10   :  { %36 = vsyncpa [#allocation12], 0 }
  0x11   :  { %37 = vsyncpa [#allocation15], 0 }
  0x12   :  { %38 = vsyncpa [#allocation18], 0 }
  0x13   :  { %39 = vsyncpa [#allocation21], 0 }
  0x14   :  { %40 = vsyncpa [#allocation24], 0 }
  0x15   :  { %41 = vsyncpa [#allocation27], 0 }
  0x16   :  { %42 = vsyncpa [#allocation30], 0 }
  0x17   :  { %43 = vsyncpa [#allocation4], 0  ;;  %s4932_s7 = smov [#allocation5]  }
  0x18   :  { %s67_s4 = sshll.u32 %s4932_s7, 4  ;;  %s68_s4 = int_to_ptr.vmem [resolvable:$true] %s67_s4 }
  0x19   :  { %s4538_s8 = scalar_lea.vmem %s68_s4, 8192  ;;  %p4543_p1 = scmp.lt.s32.totalorder %s68_s4, %s68_s4 }
  0x1a   :  { %p4539_p0 = scmp.ne.s32.totalorder %s68_s4, %s4538_s8  ;;  %p4544_p2 = scmp.lt.s32.totalorder %s4538_s8, %s4538_s8 }
  0x1c   :  { %p4545_p3 = por %p4544_p2, %p4543_p1 }
  0x1e   :  { %p4546_p4 = pnand %p4545_p3, %p4539_p0 }
  0x20   :  { %4549 = shalt.err (!%p4546_p4)
}
  0x21   :  { %s4933_s30 = smov 128   ;;  %s4934_s9 = smov 8  }
  0x22   :  { %s5384_s0 = sld [smem:[#allocation47_spill]]  ;;  %s4935_s10 = smov [#allocation8]  }
  0x23   :  { %s89_s29 = sshll.u32 %s4935_s10, 4  ;;  %s4936_s1 = smov [#allocation11]   ;;  %s90_s29 = int_to_ptr.vmem [resolvable:$true] %s89_s29 }
  0x24   :  { %s111_s6 = sshll.u32 %s4936_s1, 4  ;;  %s4558_s11 = scalar_lea.vmem %s90_s29, 4096  ;;  %s112_s6 = int_to_ptr.vmem [resolvable:$true] %s111_s6 }
  0x25   :  { %p4559_p5 = scmp.ne.s32.totalorder %s90_s29, %s4558_s11  ;;  %p4563_p6 = scmp.lt.s32.totalorder %s90_s29, %s90_s29 }
  0x26   :  { %p4564_p7 = scmp.lt.s32.totalorder %s4558_s11, %s4558_s11 }
  0x28   :  { %73 = dma.hbm_to_vmem [thread:$0]  %s5384_s0, 8192, %s68_s4, [#allocation6], %s4933_s30, %s4933_s30, %s4934_s9  }
  0x29   :  { %p4565_p8 = por %p4564_p7, %p4563_p6 }
  0x2b   :  { %p4566_p9 = pnand %p4565_p8, %p4559_p5 }
  0x2d   :  { %4569 = shalt.err (!%p4566_p9)
}
  0x2e   :  { %s5385_s7 = sld [smem:[#allocation49_spill]]  ;;  %s4578_s4 = scalar_lea.vmem %s112_s6, 1024 }
  0x2f   :  { %p4579_p10 = scmp.ne.s32.totalorder %s112_s6, %s4578_s4  ;;  %p4583_p11 = scmp.lt.s32.totalorder %s112_s6, %s112_s6 }
  0x30   :  { %p4584_p12 = scmp.lt.s32.totalorder %s4578_s4, %s4578_s4 }
  0x32   :  { %p4585_p13 = por %p4584_p12, %p4583_p11 }
  0x34   :  { %95 = dma.hbm_to_vmem [thread:$0]  %s5385_s7, 4096, %s90_s29, [#allocation9], %s4933_s30, %s4933_s30, %s4934_s9  }
  0x35   :  { %p4586_p0 = pnand %p4585_p13, %p4579_p10 }
  0x37   :  { %4589 = shalt.err (!%p4586_p0)
}
  0x38   :  { %s4937_s8 = smov 64   ;;  %s4938_s5 = smov 4  }
  0x39   :  { %s5386_s10 = sld [smem:[#allocation51_spill]]  ;;  %s4939_s1 = smov [#allocation14]  }
  0x3a   :  { %s139_s11 = sshll.u32 %s4939_s1, 4  ;;  %s4940_s29 = smov [#allocation17]   ;;  %s140_s11 = int_to_ptr.vmem [resolvable:$true] %s139_s11 }
  0x3b   :  { %s161_s2 = sshll.u32 %s4940_s29, 4  ;;  %s4598_s3 = scalar_lea.vmem %s140_s11, 512  ;;  %s162_s2 = int_to_ptr.vmem [resolvable:$true] %s161_s2 }
  0x3c   :  { %p4599_p1 = scmp.ne.s32.totalorder %s140_s11, %s4598_s3  ;;  %p4603_p2 = scmp.lt.s32.totalorder %s140_s11, %s140_s11 }
  0x3d   :  { %p4604_p3 = scmp.lt.s32.totalorder %s4598_s3, %s4598_s3 }
  0x3f   :  { %117 = dma.hbm_to_vmem [thread:$0]  %s5386_s10, 1024, %s112_s6, [#allocation12], %s4937_s8, %s4937_s8, %s4938_s5  }
  0x40   :  { %p4605_p4 = por %p4604_p3, %p4603_p2 }
  0x42   :  { %p4606_p5 = pnand %p4605_p4, %p4599_p1 }
  0x44   :  { %4609 = shalt.err (!%p4606_p5)
}
  0x45   :  { %145 = dma.hbm_to_vmem [thread:$0]  %s5356_s13, 512, %s140_s11, [#allocation15], %s4933_s30, %s4933_s30, %s4934_s9  }
  0x46   :  { %s4618_s6 = scalar_lea.vmem %s162_s2, 2048  ;;  %p4623_p7 = scmp.lt.s32.totalorder %s162_s2, %s162_s2 }
  0x47   :  { %p4619_p6 = scmp.ne.s32.totalorder %s162_s2, %s4618_s6  ;;  %p4624_p8 = scmp.lt.s32.totalorder %s4618_s6, %s4618_s6 }
  0x49   :  { %p4625_p9 = por %p4624_p8, %p4623_p7 }
  0x4b   :  { %p4626_p10 = pnand %p4625_p9, %p4619_p6 }
  0x4d   :  { %4629 = shalt.err (!%p4626_p10)
}
  0x4e   :  { %167 = dma.hbm_to_vmem [thread:$0]  %s5358_s15, 2048, %s162_s2, [#allocation18], %s4937_s8, %s4937_s8, %s4938_s5  }
  0x4f   :  { %s4941_s10 = smov [#allocation20]   ;;  %s4942_s29 = smov [#allocation23]  }
  0x50   :  { %s183_s1 = sshll.u32 %s4941_s10, 4  ;;  %s205_s13 = sshll.u32 %s4942_s29, 4  ;;  %s184_s1 = int_to_ptr.vmem [resolvable:$true] %s183_s1  ;;  %s206_s13 = int_to_ptr.vmem [resolvable:$true] %s205_s13 }
  0x51   :  { %s4638_s11 = scalar_lea.vmem %s184_s1, 1024  ;;  %p4643_p12 = scmp.lt.s32.totalorder %s184_s1, %s184_s1 }
  0x52   :  { %p4639_p11 = scmp.ne.s32.totalorder %s184_s1, %s4638_s11  ;;  %p4644_p13 = scmp.lt.s32.totalorder %s4638_s11, %s4638_s11 }
  0x54   :  { %p4645_p0 = por %p4644_p13, %p4643_p12 }
  0x56   :  { %p4646_p1 = pnand %p4645_p0, %p4639_p11 }
  0x58   :  { %4649 = shalt.err (!%p4646_p1)
}
  0x59   :  { %189 = dma.hbm_to_vmem [thread:$0]  %s5360_s17, 1024, %s184_s1, [#allocation21], %s4937_s8, %s4937_s8, %s4938_s5  }
  0x5a   :  { %s4658_s15 = scalar_lea.vmem %s206_s13, 2048  ;;  %p4663_p3 = scmp.lt.s32.totalorder %s206_s13, %s206_s13 }
  0x5b   :  { %p4659_p2 = scmp.ne.s32.totalorder %s206_s13, %s4658_s15  ;;  %p4664_p4 = scmp.lt.s32.totalorder %s4658_s15, %s4658_s15 }
  0x5d   :  { %p4665_p5 = por %p4664_p4, %p4663_p3 }
  0x5f   :  { %p4666_p6 = pnand %p4665_p5, %p4659_p2 }
  0x61   :  { %4669 = shalt.err (!%p4666_p6)
}
  0x62   :  { %211 = dma.hbm_to_vmem [thread:$0]  %s5362_s19, 2048, %s206_s13, [#allocation24], %s4933_s30, %s4933_s30, %s4934_s9  }
  0x63   :  { %s4943_s6 = smov [#allocation26]   ;;  %s4944_s0 = smov [#allocation2]  }
  0x64   :  { %s227_s28 = sshll.u32 %s4943_s6, 4  ;;  %s53_s17 = sshll.u32 %s4944_s0, 4  ;;  %s228_s28 = int_to_ptr.vmem [resolvable:$true] %s227_s28  ;;  %s54_s17 = int_to_ptr.vmem [resolvable:$true] %s53_s17 }
  0x65   :  { %s4678_s8 = scalar_lea.vmem %s228_s28, 8192  ;;  %p4683_p8 = scmp.lt.s32.totalorder %s228_s28, %s228_s28 }
  0x66   :  { %p4679_p7 = scmp.ne.s32.totalorder %s228_s28, %s4678_s8  ;;  %p4684_p9 = scmp.lt.s32.totalorder %s4678_s8, %s4678_s8 }
  0x68   :  { %p4685_p10 = por %p4684_p9, %p4683_p8 }
  0x6a   :  { %p4686_p11 = pnand %p4685_p10, %p4679_p7 }
  0x6c   :  { %4689 = shalt.err (!%p4686_p11)
}
  0x6d   :  { %s4945_s5 = smov 256   ;;  %s4946_s10 = smov 16  }
  0x6e   :  { %233 = dma.hbm_to_vmem [thread:$0]  %s5364_s21, 8192, %s228_s28, [#allocation27], %s4945_s5, %s4945_s5, %s4946_s10  }
  0x6f   :  { %s4698_s19 = scalar_lea.vmem %s54_s17, 8192  ;;  %p4703_p13 = scmp.lt.s32.totalorder %s54_s17, %s54_s17 }
  0x70   :  { %p4699_p12 = scmp.ne.s32.totalorder %s54_s17, %s4698_s19  ;;  %p4704_p0 = scmp.lt.s32.totalorder %s4698_s19, %s4698_s19 }
  0x72   :  { %p4705_p1 = por %p4704_p0, %p4703_p13 }
  0x74   :  { %p4706_p2 = pnand %p4705_p1, %p4699_p12 }
  0x76   :  { %4709 = shalt.err (!%p4706_p2)
}
  0x77   :  { %s5387_s3 = sld [smem:[#allocation45_spill]]  ;;  %s4947_s7 = smov [#allocation7]  }
  0x78   :  { %s80_s15 = sshll.u32 %s4947_s7, 4  ;;  %s4948_s2 = smov [#allocation10]   ;;  %s81_s15 = int_to_ptr.vmem [resolvable:$true] %s80_s15 }
  0x79   :  { %s102_s4 = sshll.u32 %s4948_s2, 4  ;;  %s4718_s6 = scalar_lea.vmem %s81_s15, 32  ;;  %s103_s4 = int_to_ptr.vmem [resolvable:$true] %s102_s4 }
  0x7a   :  { %p4719_p3 = scmp.ne.s32.totalorder %s81_s15, %s4718_s6  ;;  %p4723_p4 = scmp.lt.s32.totalorder %s81_s15, %s81_s15 }
  0x7b   :  { %p4724_p5 = scmp.lt.s32.totalorder %s4718_s6, %s4718_s6 }
  0x7d   :  { %59 = dma.hbm_to_vmem [thread:$0]  %s5387_s3, 8192, %s54_s17, [#allocation3], %s4945_s5, %s4945_s5, %s4946_s10  }
  0x7e   :  { %p4725_p6 = por %p4724_p5, %p4723_p4 }
  0x80   :  { %p4726_p7 = pnand %p4725_p6, %p4719_p3 }
  0x82   :  { %4729 = shalt.err (!%p4726_p7)
}
  0x83   :  { %s5388_s0 = sld [smem:[#allocation48_spill]]  ;;  %s4738_s8 = scalar_lea.vmem %s103_s4, 32 }
  0x84   :  { %p4739_p8 = scmp.ne.s32.totalorder %s103_s4, %s4738_s8  ;;  %p4743_p9 = scmp.lt.s32.totalorder %s103_s4, %s103_s4 }
  0x85   :  { %p4744_p10 = scmp.lt.s32.totalorder %s4738_s8, %s4738_s8 }
  0x87   :  { %p4745_p11 = por %p4744_p10, %p4743_p9 }
  0x89   :  { %83 = dma.hbm_to_vmem [thread:$0]  %s5388_s0, 32, %s81_s15, [#allocation6]  }
  0x8a   :  { %p4746_p12 = pnand %p4745_p11, %p4739_p8 }
  0x8c   :  { %4749 = shalt.err (!%p4746_p12)
}
  0x8d   :  { %s5389_s10 = sld [smem:[#allocation50_spill]]  ;;  %s4949_s1 = smov [#allocation13]  }
  0x8e   :  { %s128_s29 = sshll.u32 %s4949_s1, 4  ;;  %s4950_s19 = smov [#allocation16]   ;;  %s129_s29 = int_to_ptr.vmem [resolvable:$true] %s128_s29 }
  0x8f   :  { %s152_s13 = sshll.u32 %s4950_s19, 4  ;;  %s4758_s11 = scalar_lea.vmem %s129_s29, 16  ;;  %s153_s13 = int_to_ptr.vmem [resolvable:$true] %s152_s13 }
  0x90   :  { %p4759_p13 = scmp.ne.s32.totalorder %s129_s29, %s4758_s11  ;;  %s4762_s3 = scalar_lea.vmem %s129_s29, 32 }
  0x91   :  { %p4763_p0 = scmp.lt.s32.totalorder %s129_s29, %s129_s29  ;;  %p4764_p1 = scmp.lt.s32.totalorder %s4762_s3, %s4758_s11 }
  0x93   :  { %105 = dma.hbm_to_vmem [thread:$0]  %s5389_s10, 32, %s103_s4, [#allocation9]  }
  0x94   :  { %p4765_p2 = por %p4764_p1, %p4763_p0 }
  0x96   :  { %p4766_p3 = pnand %p4765_p2, %p4759_p13 }
  0x98   :  { %4769 = shalt.err (!%p4766_p3)
}
  0x99   :  { %s5390_s2 = sld [smem:[#allocation54_spill]]  ;;  %s4778_s6 = scalar_lea.vmem %s153_s13, 32 }
  0x9a   :  { %p4779_p4 = scmp.ne.s32.totalorder %s153_s13, %s4778_s6  ;;  %p4783_p5 = scmp.lt.s32.totalorder %s153_s13, %s153_s13 }
  0x9b   :  { %p4784_p6 = scmp.lt.s32.totalorder %s4778_s6, %s4778_s6 }
  0x9d   :  { %p4785_p7 = por %p4784_p6, %p4783_p5 }
  0x9f   :  { %131 = dma.hbm_to_vmem [thread:$0]  %s5390_s2, 16, %s129_s29, [#allocation12]  }
  0xa0   :  { %p4786_p8 = pnand %p4785_p7, %p4779_p4 }
  0xa2   :  { %4789 = shalt.err (!%p4786_p8)
}
  0xa3   :  { %155 = dma.hbm_to_vmem [thread:$0]  %s5357_s14, 32, %s153_s13, [#allocation15]  }
  0xa4   :  { %s4951_s28 = smov [#allocation19]   ;;  %s4952_s8 = smov [#allocation22]  }
  0xa5   :  { %s174_s0 = sshll.u32 %s4951_s28, 4  ;;  %s196_s17 = sshll.u32 %s4952_s8, 4  ;;  %s175_s0 = int_to_ptr.vmem [resolvable:$true] %s174_s0  ;;  %s197_s17 = int_to_ptr.vmem [resolvable:$true] %s196_s17 }
  0xa6   :  { %s4798_s5 = scalar_lea.vmem %s175_s0, 16  ;;  %s4802_s10 = scalar_lea.vmem %s175_s0, 32 }
  0xa7   :  { %p4799_p9 = scmp.ne.s32.totalorder %s175_s0, %s4798_s5  ;;  %p4803_p10 = scmp.lt.s32.totalorder %s175_s0, %s175_s0 }
  0xa8   :  { %p4804_p11 = scmp.lt.s32.totalorder %s4802_s10, %s4798_s5 }
  0xaa   :  { %p4805_p12 = por %p4804_p11, %p4803_p10 }
  0xac   :  { %p4806_p13 = pnand %p4805_p12, %p4799_p9 }
  0xae   :  { %4809 = shalt.err (!%p4806_p13)
}
  0xaf   :  { %177 = dma.hbm_to_vmem [thread:$0]  %s5359_s16, 16, %s175_s0, [#allocation18]  }
  0xb0   :  { %s4818_s19 = scalar_lea.vmem %s197_s17, 16  ;;  %s4822_s14 = scalar_lea.vmem %s197_s17, 32 }
  0xb1   :  { %p4819_p0 = scmp.ne.s32.totalorder %s197_s17, %s4818_s19  ;;  %p4823_p1 = scmp.lt.s32.totalorder %s197_s17, %s197_s17 }
  0xb2   :  { %p4824_p2 = scmp.lt.s32.totalorder %s4822_s14, %s4818_s19 }
  0xb4   :  { %p4825_p3 = por %p4824_p2, %p4823_p1 }
  0xb6   :  { %p4826_p4 = pnand %p4825_p3, %p4819_p0 }
  0xb8   :  { %4829 = shalt.err (!%p4826_p4)
}
  0xb9   :  { %199 = dma.hbm_to_vmem [thread:$0]  %s5361_s18, 16, %s197_s17, [#allocation21]  }
  0xba   :  { %s4953_s3 = smov [#allocation25]   ;;  %s4954_s15 = smov [#allocation28]  }
  0xbb   :  { %s218_s7 = sshll.u32 %s4953_s3, 4  ;;  %s241_s2 = sshll.u32 %s4954_s15, 4  ;;  %s219_s7 = int_to_ptr.vmem [resolvable:$true] %s218_s7  ;;  %s242_s2 = int_to_ptr.vmem [resolvable:$true] %s241_s2 }
  0xbc   :  { %s4838_s6 = scalar_lea.vmem %s219_s7, 32  ;;  %p4843_p6 = scmp.lt.s32.totalorder %s219_s7, %s219_s7 }
  0xbd   :  { %p4839_p5 = scmp.ne.s32.totalorder %s219_s7, %s4838_s6  ;;  %p4844_p7 = scmp.lt.s32.totalorder %s4838_s6, %s4838_s6 }
  0xbf   :  { %p4845_p8 = por %p4844_p7, %p4843_p6 }
  0xc1   :  { %p4846_p9 = pnand %p4845_p8, %p4839_p5 }
  0xc3   :  { %4849 = shalt.err (!%p4846_p9)
}
  0xc4   :  { %221 = dma.hbm_to_vmem [thread:$0]  %s5363_s20, 32, %s219_s7, [#allocation24]  }
  0xc5   :  { %s4858_s21 = scalar_lea.vmem %s242_s2, 8192  ;;  %p4863_p11 = scmp.lt.s32.totalorder %s242_s2, %s242_s2 }
  0xc6   :  { %p4859_p10 = scmp.ne.s32.totalorder %s242_s2, %s4858_s21  ;;  %p4864_p12 = scmp.lt.s32.totalorder %s4858_s21, %s4858_s21 }
  0xc8   :  { %p4865_p13 = por %p4864_p12, %p4863_p11 }
  0xca   :  { %p4866_p0 = pnand %p4865_p13, %p4859_p10 }
  0xcc   :  { %4869 = shalt.err (!%p4866_p0)
}
  0xcd   :  { %247 = dma.hbm_to_vmem [thread:$0]  %s5366_s23, 8192, %s242_s2, [#allocation27], %s4933_s30, %s4933_s30, %s4934_s9  }
  0xce   :  { %s4955_s0 = smov [#allocation29]  }
  0xcf   :  { %s254_s8 = sshll.u32 %s4955_s0, 4  ;;  %s255_s8 = int_to_ptr.vmem [resolvable:$true] %s254_s8 }
  0xd0   :  { %s4878_s17 = scalar_lea.vmem %s255_s8, 32  ;;  %p4883_p2 = scmp.lt.s32.totalorder %s255_s8, %s255_s8 }
  0xd1   :  { %p4879_p1 = scmp.ne.s32.totalorder %s255_s8, %s4878_s17  ;;  %p4884_p3 = scmp.lt.s32.totalorder %s4878_s17, %s4878_s17 }
  0xd3   :  { %p4885_p4 = por %p4884_p3, %p4883_p2 }
  0xd5   :  { %p4886_p5 = pnand %p4885_p4, %p4879_p1 }
  0xd7   :  { %4889 = shalt.err (!%p4886_p5)
}
  0xd8   :  { %257 = dma.hbm_to_vmem [thread:$0]  %s5367_s24, 32, %s255_s8, [#allocation30]  }
  0xd9   :  { %4910 = dma.done.wait [#allocation3], 8192  }
  0xda   :  { %4911 = vsyncadd [#allocation3], 4294959104 }
  0xdb   :  { %4912 = dma.done.wait [#allocation6], 8224  }
  0xdc   :  { %4913 = vsyncadd [#allocation6], 4294959072 }
  0xdd   :  { %4914 = dma.done.wait [#allocation9], 4128  }
  0xde   :  { %4915 = vsyncadd [#allocation9], 4294963168 }
  0xdf   :  { %4916 = dma.done.wait [#allocation12], 1040  }
  0xe0   :  { %4917 = vsyncadd [#allocation12], 4294966256 }
  0xe1   :  { %4918 = dma.done.wait [#allocation15], 544  }
  0xe2   :  { %4919 = vsyncadd [#allocation15], 4294966752 }
  0xe3   :  { %4920 = dma.done.wait [#allocation18], 2064  }
  0xe4   :  { %4921 = vsyncadd [#allocation18], 4294965232 }
  0xe5   :  { %4922 = dma.done.wait [#allocation21], 1040  }
  0xe6   :  { %4923 = vsyncadd [#allocation21], 4294966256 }
  0xe7   :  { %4924 = dma.done.wait [#allocation24], 2080  }
  0xe8   :  { %4925 = vsyncadd [#allocation24], 4294965216 }
  0xe9   :  { %4926 = dma.done.wait [#allocation27], 16384  }
  0xea   :  { %4927 = vsyncadd [#allocation27], 4294950912 }
  0xeb   :  { %4928 = dma.done.wait [#allocation30], 32  }
  0xec   :  { %4929 = vsyncadd [#allocation30], 4294967264  ;;  %v3996_v0 = vld [vmem:[#allocation2 + $0xe4] ss:$16 sps:$4 sm:$0xff]   ;;  %v3998_v1 = vld [vmem:[#allocation2 + $0xec] ss:$16 sps:$4 sm:$0xff]  }
  0xed   :  { %734 = vmatprep.subr.bf16.mxu0 %v3996_v0  ;;  %v4000_v2 = vld [vmem:[#allocation2 + $0xe0] ss:$16 sps:$4 sm:$0xff]   ;;  %v4001_v3 = vld [vmem:[#allocation2 + $0xe8] ss:$16 sps:$4 sm:$0xff]   ;;  %775 = vmatprep.subr.bf16.mxu1 %v3998_v1  ;;  %v4002_v4 = vld [vmem:[#allocation2 + $0xc4] ss:$16 sps:$4 sm:$0xff]  }
  0xee   :  { %735 = vmatpush1.bf16.msra.mxu0 %v4000_v2  ;;  %776 = vmatpush1.bf16.msra.mxu1 %v4001_v3  ;;  %v4004_v5 = vld [vmem:[#allocation2 + $0xcc] ss:$16 sps:$4 sm:$0xff]   ;;  %v4006_v6 = vld [vmem:[#allocation2 + $0xc0] ss:$16 sps:$4 sm:$0xff]   ;;  %v4007_v7 = vld [vmem:[#allocation2 + $0xc8] ss:$16 sps:$4 sm:$0xff]  }
  0xef   :  { %736 = vmatprep.subr.bf16.mxu0 %v4002_v4  ;;  %777 = vmatprep.subr.bf16.mxu1 %v4004_v5  ;;  %v4008_v8 = vld [vmem:[#allocation2 + $0xa4] ss:$16 sps:$4 sm:$0xff]   ;;  %v4010_v9 = vld [vmem:[#allocation2 + $0xac] ss:$16 sps:$4 sm:$0xff]   ;;  %v4012_v10 = vld [vmem:[#allocation2 + $0xa0] ss:$16 sps:$4 sm:$0xff]  }
  0xf0   :  { %v4013_v11 = vld [vmem:[#allocation2 + $0xa8] ss:$16 sps:$4 sm:$0xff]   ;;  %v4014_v12 = vld [vmem:[#allocation2 + $0x84] ss:$16 sps:$4 sm:$0xff]   ;;  %v4016_v13 = vld [vmem:[#allocation2 + $0x8c] ss:$16 sps:$4 sm:$0xff]  }
  0xf1   :  { %v4018_v14 = vld [vmem:[#allocation2 + $0x80] ss:$16 sps:$4 sm:$0xff]   ;;  %v4019_v15 = vld [vmem:[#allocation2 + $0x88] ss:$16 sps:$4 sm:$0xff]   ;;  %v4020_v16 = vld [vmem:[#allocation2 + $0x64] ss:$16 sps:$4 sm:$0xff]  }
  0xf2   :  { %737 = vmatpush1.bf16.msra.mxu0 %v4006_v6  ;;  %778 = vmatpush1.bf16.msra.mxu1 %v4007_v7  ;;  %v4022_v17 = vld [vmem:[#allocation2 + $0x6c] ss:$16 sps:$4 sm:$0xff]   ;;  %v4024_v18 = vld [vmem:[#allocation2 + $0x60] ss:$16 sps:$4 sm:$0xff]   ;;  %v4025_v19 = vld [vmem:[#allocation2 + $0x68] ss:$16 sps:$4 sm:$0xff]  }
  0xf3   :  { %738 = vmatprep.subr.bf16.mxu0 %v4008_v8  ;;  %779 = vmatprep.subr.bf16.mxu1 %v4010_v9  ;;  %v4026_v20 = vld [vmem:[#allocation2 + $0x44] ss:$16 sps:$4 sm:$0xff]   ;;  %v4028_v21 = vld [vmem:[#allocation2 + $0x4c] ss:$16 sps:$4 sm:$0xff]   ;;  %v4030_v22 = vld [vmem:[#allocation2 + $0x40] ss:$16 sps:$4 sm:$0xff]  }
  0xf4   :  { %v4031_v23 = vld [vmem:[#allocation2 + $0x48] ss:$16 sps:$4 sm:$0xff]   ;;  %v4032_v24 = vld [vmem:[#allocation2 + $0x24] ss:$16 sps:$4 sm:$0xff]   ;;  %v4034_v25 = vld [vmem:[#allocation2 + $0x2c] ss:$16 sps:$4 sm:$0xff]  }
  0xf5   :  { %v4036_v26 = vld [vmem:[#allocation2 + $0x20] ss:$16 sps:$4 sm:$0xff]   ;;  %v4037_v27 = vld [vmem:[#allocation2 + $0x28] ss:$16 sps:$4 sm:$0xff]   ;;  %v4038_v28 = vld [vmem:[#allocation2 + $0x4] ss:$16 sps:$4 sm:$0xff]  }
  0xf6   :  { %739 = vmatpush1.bf16.msra.mxu0 %v4012_v10  ;;  %780 = vmatpush1.bf16.msra.mxu1 %v4013_v11  ;;  %v4040_v29 = vld [vmem:[#allocation2 + $0xc] ss:$16 sps:$4 sm:$0xff]   ;;  %v4042_v30 = vld [vmem:[#allocation2] ss:$16 sps:$4 sm:$0xff]   ;;  %v4043_v31 = vld [vmem:[#allocation2 + $0x8] ss:$16 sps:$4 sm:$0xff]  }
  0xf7   :  { %740 = vmatprep.subr.bf16.mxu0 %v4014_v12  ;;  %781 = vmatprep.subr.bf16.mxu1 %v4016_v13  ;;  %v4044_v32 = vld [vmem:[#allocation2 + $0x1e4] ss:$16 sps:$4 sm:$0xff]   ;;  %v4046_v33 = vld [vmem:[#allocation2 + $0x1ec] ss:$16 sps:$4 sm:$0xff]   ;;  %v4048_v34 = vld [vmem:[#allocation2 + $0x1e0] ss:$16 sps:$4 sm:$0xff]  }
  0xf8   :  { %v4049_v35 = vld [vmem:[#allocation2 + $0x1e8] ss:$16 sps:$4 sm:$0xff]   ;;  %v4050_v36 = vld [vmem:[#allocation2 + $0x1c4] ss:$16 sps:$4 sm:$0xff]   ;;  %v4052_v37 = vld [vmem:[#allocation2 + $0x1cc] ss:$16 sps:$4 sm:$0xff]  }
  0xf9   :  { %v4054_v38 = vld [vmem:[#allocation2 + $0x1c0] ss:$16 sps:$4 sm:$0xff]   ;;  %v4055_v39 = vld [vmem:[#allocation2 + $0x1c8] ss:$16 sps:$4 sm:$0xff]   ;;  %v4056_v40 = vld [vmem:[#allocation2 + $0x1a4] ss:$16 sps:$4 sm:$0xff]  }
  0xfa   :  { %741 = vmatpush1.bf16.msra.mxu0 %v4018_v14  ;;  %782 = vmatpush1.bf16.msra.mxu1 %v4019_v15  ;;  %v4058_v41 = vld [vmem:[#allocation2 + $0x1ac] ss:$16 sps:$4 sm:$0xff]   ;;  %v4060_v42 = vld [vmem:[#allocation2 + $0x1a0] ss:$16 sps:$4 sm:$0xff]   ;;  %v4061_v43 = vld [vmem:[#allocation2 + $0x1a8] ss:$16 sps:$4 sm:$0xff]  }
  0xfb   :  { %742 = vmatprep.subr.bf16.mxu0 %v4020_v16  ;;  %783 = vmatprep.subr.bf16.mxu1 %v4022_v17  ;;  %v4062_v44 = vld [vmem:[#allocation2 + $0x184] ss:$16 sps:$4 sm:$0xff]   ;;  %v4064_v45 = vld [vmem:[#allocation2 + $0x18c] ss:$16 sps:$4 sm:$0xff]   ;;  %s5391_s30 = sld [smem:[#allocation43_spill]]  ;;  %vm4957_vm0 = vmmov 0  }
  0xfc   :  { %v4066_v47 = vld [vmem:[#allocation2 + $0x180] ss:$16 sps:$4 sm:$0xff]   ;;  %v4067_v48 = vld [vmem:[#allocation2 + $0x188] ss:$16 sps:$4 sm:$0xff]   ;;  %v4068_v50 = vld [vmem:[#allocation2 + $0x164] ss:$16 sps:$4 sm:$0xff]  }
  0xfd   :  { %v4070_v51 = vld [vmem:[#allocation2 + $0x16c] ss:$16 sps:$4 sm:$0xff]   ;;  %v4072_v53 = vld [vmem:[#allocation2 + $0x160] ss:$16 sps:$4 sm:$0xff]   ;;  %v4073_v54 = vld [vmem:[#allocation2 + $0x168] ss:$16 sps:$4 sm:$0xff]  }
  0xfe   :  { %743 = vmatpush1.bf16.msra.mxu0 %v4024_v18  ;;  %784 = vmatpush1.bf16.msra.mxu1 %v4025_v19  ;;  %v4074_v55 = vld [vmem:[#allocation2 + $0x144] ss:$16 sps:$4 sm:$0xff]   ;;  %v4076_v56 = vld [vmem:[#allocation2 + $0x14c] ss:$16 sps:$4 sm:$0xff]   ;;  %v4078_v57 = vld [vmem:[#allocation2 + $0x140] ss:$16 sps:$4 sm:$0xff]  }
  0xff   :  { %744 = vmatprep.subr.bf16.mxu0 %v4026_v20  ;;  %785 = vmatprep.subr.bf16.mxu1 %v4028_v21  ;;  %v4079_v58 = vld [vmem:[#allocation2 + $0x148] ss:$16 sps:$4 sm:$0xff]   ;;  %v4080_v59 = vld [vmem:[#allocation2 + $0x124] ss:$16 sps:$4 sm:$0xff]   ;;  %v4082_v60 = vld [vmem:[#allocation2 + $0x12c] ss:$16 sps:$4 sm:$0xff]  }
 0x100   :  { %v4084_v61 = vld [vmem:[#allocation2 + $0x120] ss:$16 sps:$4 sm:$0xff]   ;;  %v4085_v62 = vld [vmem:[#allocation2 + $0x128] ss:$16 sps:$4 sm:$0xff]   ;;  %v4086_v63 = vld [vmem:[#allocation2 + $0x104] ss:$16 sps:$4 sm:$0xff]  }
 0x101   :  { %v3487_v46 = vld.sshfl [vmem:[%s5391_s30] sm:$0x33 pattern:$0x76325410]  ;;  %v4088_v0 = vld [vmem:[#allocation2 + $0x10c] ss:$16 sps:$4 sm:$0xff]  }
 0x102   :  { %745 = vmatpush1.bf16.msra.mxu0 %v4030_v22  ;;  %786 = vmatpush1.bf16.msra.mxu1 %v4031_v23  ;;  %v323_v49 = vcombine.high %v3487_v46, %v3487_v46  ;;  %v4090_v1 = vld [vmem:[#allocation2 + $0x100] ss:$16 sps:$4 sm:$0xff]   ;;  %v4091_v2 = vld [vmem:[#allocation2 + $0x108] ss:$16 sps:$4 sm:$0xff]   ;;  %v4094_v3 = vld [vmem:[#allocation5 + $0x174] ss:$8 sps:$4 sm:$0xff]   ;;  %v326_v5 = vpack.c.bf16 %v3487_v46, %v3487_v46 }
 0x103   :  { %746 = vmatprep.subr.bf16.mxu0 %v4032_v24  ;;  %787 = vmatprep.subr.bf16.mxu1 %v4034_v25  ;;  %v4097_v4 = vld [vmem:[#allocation5 + $0x74] ss:$8 sps:$4 sm:$0xff]   ;;  %v4092_v6 = vld [vmem:[#allocation5 + $0x170] ss:$8 sps:$4 sm:$0xff]   ;;  %v4100_v8 = vld [vmem:[#allocation5 + $0x164] ss:$8 sps:$4 sm:$0xff]  }
 0x104   :  { %v327_v52 = vpack.c.bf16 %v323_v49, %v323_v49  ;;  %v4095_v7 = vld [vmem:[#allocation5 + $0x70] ss:$8 sps:$4 sm:$0xff]   ;;  %v4103_v9 = vld [vmem:[#allocation5 + $0x64] ss:$8 sps:$4 sm:$0xff]   ;;  %v4098_v10 = vld [vmem:[#allocation5 + $0x160] ss:$8 sps:$4 sm:$0xff]  }
 0x105   :  { %v4101_v11 = vld [vmem:[#allocation5 + $0x60] ss:$8 sps:$4 sm:$0xff]   ;;  %v4106_v12 = vld [vmem:[#allocation5 + $0x154] ss:$8 sps:$4 sm:$0xff]   ;;  %v4104_v14 = vld [vmem:[#allocation5 + $0x150] ss:$8 sps:$4 sm:$0xff]  }
 0x106   :  { %747 = vmatpush1.bf16.msra.mxu0 %v4036_v26  ;;  %788 = vmatpush1.bf16.msra.mxu1 %v4037_v27  ;;  %v4109_v13 = vld [vmem:[#allocation5 + $0x54] ss:$8 sps:$4 sm:$0xff]   ;;  %v4107_v15 = vld [vmem:[#allocation5 + $0x50] ss:$8 sps:$4 sm:$0xff]   ;;  %v4112_v16 = vld [vmem:[#allocation5 + $0x144] ss:$8 sps:$4 sm:$0xff]  }
 0x107   :  { %748 = vmatprep.subr.bf16.mxu0 %v4038_v28  ;;  %789 = vmatprep.subr.bf16.mxu1 %v4040_v29  ;;  %v4115_v17 = vld [vmem:[#allocation5 + $0x44] ss:$8 sps:$4 sm:$0xff]   ;;  %v4110_v18 = vld [vmem:[#allocation5 + $0x140] ss:$8 sps:$4 sm:$0xff]   ;;  %v4118_v20 = vld [vmem:[#allocation5 + $0x134] ss:$8 sps:$4 sm:$0xff]  }
 0x108   :  { %766 = vmatprep.mubr.bf16.mxu0 %v327_v52  ;;  %807 = vmatprep.mubr.bf16.mxu1 %v327_v52  ;;  %v4113_v19 = vld [vmem:[#allocation5 + $0x40] ss:$8 sps:$4 sm:$0xff]   ;;  %v4121_v21 = vld [vmem:[#allocation5 + $0x34] ss:$8 sps:$4 sm:$0xff]   ;;  %v4116_v22 = vld [vmem:[#allocation5 + $0x130] ss:$8 sps:$4 sm:$0xff]  }
 0x109   :  { %v4119_v23 = vld [vmem:[#allocation5 + $0x30] ss:$8 sps:$4 sm:$0xff]   ;;  %v4124_v24 = vld [vmem:[#allocation5 + $0x124] ss:$8 sps:$4 sm:$0xff]   ;;  %v4122_v26 = vld [vmem:[#allocation5 + $0x120] ss:$8 sps:$4 sm:$0xff]  }
 0x10a   :  { %749 = vmatpush1.bf16.msra.mxu0 %v4042_v30  ;;  %790 = vmatpush1.bf16.msra.mxu1 %v4043_v31  ;;  %v4127_v25 = vld [vmem:[#allocation5 + $0x24] ss:$8 sps:$4 sm:$0xff]   ;;  %v4125_v27 = vld [vmem:[#allocation5 + $0x20] ss:$8 sps:$4 sm:$0xff]   ;;  %v4130_v28 = vld [vmem:[#allocation5 + $0x114] ss:$8 sps:$4 sm:$0xff]  }
 0x10b   :  { %750 = vmatprep.subr.bf16.mxu0 %v4044_v32  ;;  %791 = vmatprep.subr.bf16.mxu1 %v4046_v33  ;;  %v4133_v29 = vld [vmem:[#allocation5 + $0x14] ss:$8 sps:$4 sm:$0xff]   ;;  %v4128_v30 = vld [vmem:[#allocation5 + $0x110] ss:$8 sps:$4 sm:$0xff]   ;;  %v4136_v32 = vld [vmem:[#allocation5 + $0x104] ss:$8 sps:$4 sm:$0xff]  }
 0x10c   :  { %v4131_v31 = vld [vmem:[#allocation5 + $0x10] ss:$8 sps:$4 sm:$0xff]   ;;  %v4139_v33 = vld [vmem:[#allocation5 + $0x4] ss:$8 sps:$4 sm:$0xff]   ;;  %v4166_v52 = vld [vmem:[#allocation5 + $0x1b4] ss:$8 sps:$4 sm:$0xff]  }
 0x10d   :  { %v4152_v46 = vld [vmem:[#allocation5 + $0x1d0] ss:$8 sps:$4 sm:$0xff]   ;;  %v4163_v49 = vld [vmem:[#allocation5 + $0xc4] ss:$8 sps:$4 sm:$0xff]   ;;  %s5392_s1 = sld [smem:[#allocation46_spill]]  ;;  %vm1819_vm1 = vcmask 261120  }
 0x10e   :  { %751 = vmatpush2.bf16.msra.mxu0 %v4048_v34  ;;  %792 = vmatpush2.bf16.msra.mxu1 %v4049_v35  ;;  %v4134_v34 = vld [vmem:[#allocation5 + $0x100] ss:$8 sps:$4 sm:$0xff]   ;;  %s5393_s14 = sld [smem:[#allocation44_spill]] }
 0x10f   :  { %752 = vmatprep.subr.bf16.mxu0 %v4050_v36  ;;  %793 = vmatprep.subr.bf16.mxu1 %v4052_v37  ;;  %v4137_v35 = vld [vmem:[#allocation5] ss:$8 sps:$4 sm:$0xff]   ;;  %v4142_v36 = vld [vmem:[#allocation5 + $0x1f4] ss:$8 sps:$4 sm:$0xff]   ;;  %s5394_s3 = sld [smem:[#allocation53_spill]] }
 0x110   :  { %v4145_v37 = vld [vmem:[#allocation5 + $0xf4] ss:$8 sps:$4 sm:$0xff]   ;;  %s5395_s10 = sld [smem:[#allocation52_spill]] }
 0x112   :  { %753 = vmatpush2.bf16.msra.mxu0 %v4054_v38  ;;  %794 = vmatpush2.bf16.msra.mxu1 %v4055_v39  ;;  %v4140_v38 = vld [vmem:[#allocation5 + $0x1f0] ss:$8 sps:$4 sm:$0xff]  }
 0x113   :  { %754 = vmatprep.subr.bf16.mxu0 %v4056_v40  ;;  %795 = vmatprep.subr.bf16.mxu1 %v4058_v41  ;;  %v4143_v39 = vld [vmem:[#allocation5 + $0xf0] ss:$8 sps:$4 sm:$0xff]   ;;  %v4148_v40 = vld [vmem:[#allocation5 + $0x1e4] ss:$8 sps:$4 sm:$0xff]  }
 0x114   :  { %v4151_v41 = vld [vmem:[#allocation5 + $0xe4] ss:$8 sps:$4 sm:$0xff]  }
 0x116   :  { %755 = vmatpush2.bf16.msra.mxu0 %v4060_v42  ;;  %796 = vmatpush2.bf16.msra.mxu1 %v4061_v43  ;;  %v4146_v42 = vld [vmem:[#allocation5 + $0x1e0] ss:$8 sps:$4 sm:$0xff]  }
 0x117   :  { %756 = vmatprep.subr.bf16.mxu0 %v4062_v44  ;;  %797 = vmatprep.subr.bf16.mxu1 %v4064_v45  ;;  %v4149_v43 = vld [vmem:[#allocation5 + $0xe0] ss:$8 sps:$4 sm:$0xff]   ;;  %v4154_v44 = vld [vmem:[#allocation5 + $0x1d4] ss:$8 sps:$4 sm:$0xff]  }
 0x118   :  { %v4157_v45 = vld [vmem:[#allocation5 + $0xd4] ss:$8 sps:$4 sm:$0xff]  }
 0x11a   :  { %757 = vmatpush2.bf16.msra.mxu0 %v4066_v47  ;;  %798 = vmatpush2.bf16.msra.mxu1 %v4067_v48  ;;  %v4155_v47 = vld [vmem:[#allocation5 + $0xd0] ss:$8 sps:$4 sm:$0xff]   ;;  %v4160_v48 = vld [vmem:[#allocation5 + $0x1c4] ss:$8 sps:$4 sm:$0xff]  }
 0x11b   :  { %758 = vmatprep.subr.bf16.mxu0 %v4068_v50  ;;  %799 = vmatprep.subr.bf16.mxu1 %v4070_v51  ;;  %v4158_v50 = vld [vmem:[#allocation5 + $0x1c0] ss:$8 sps:$4 sm:$0xff]  }
 0x11c   :  { %v4161_v51 = vld [vmem:[#allocation5 + $0xc0] ss:$8 sps:$4 sm:$0xff]  }
 0x11e   :  { %759 = vmatpush2.bf16.msra.mxu0 %v4072_v53  ;;  %800 = vmatpush2.bf16.msra.mxu1 %v4073_v54  ;;  %v4169_v53 = vld [vmem:[#allocation5 + $0xb4] ss:$8 sps:$4 sm:$0xff]   ;;  %v4164_v54 = vld [vmem:[#allocation5 + $0x1b0] ss:$8 sps:$4 sm:$0xff]  }
 0x11f   :  { %760 = vmatprep.subr.bf16.mxu0 %v4074_v55  ;;  %801 = vmatprep.subr.bf16.mxu1 %v4076_v56  ;;  %v4167_v55 = vld [vmem:[#allocation5 + $0xb0] ss:$8 sps:$4 sm:$0xff]   ;;  %v4172_v56 = vld [vmem:[#allocation5 + $0x1a4] ss:$8 sps:$4 sm:$0xff]  }
 0x122   :  { %761 = vmatpush2.bf16.msra.mxu0 %v4078_v57  ;;  %802 = vmatpush2.bf16.msra.mxu1 %v4079_v58  ;;  %v4175_v57 = vld [vmem:[#allocation5 + $0xa4] ss:$8 sps:$4 sm:$0xff]   ;;  %v4170_v58 = vld [vmem:[#allocation5 + $0x1a0] ss:$8 sps:$4 sm:$0xff]  }
 0x123   :  { %762 = vmatprep.subr.bf16.mxu0 %v4080_v59  ;;  %803 = vmatprep.subr.bf16.mxu1 %v4082_v60  ;;  %v4173_v59 = vld [vmem:[#allocation5 + $0xa0] ss:$8 sps:$4 sm:$0xff]   ;;  %v4178_v60 = vld [vmem:[#allocation5 + $0x194] ss:$8 sps:$4 sm:$0xff]  }
 0x126   :  { %763 = vmatpush2.bf16.msra.mxu0 %v4084_v61  ;;  %804 = vmatpush2.bf16.msra.mxu1 %v4085_v62  ;;  %v4176_v61 = vld [vmem:[#allocation5 + $0x190] ss:$8 sps:$4 sm:$0xff]   ;;  %v4181_v62 = vld [vmem:[#allocation5 + $0x94] ss:$8 sps:$4 sm:$0xff]  }
 0x127   :  { %764 = vmatprep.subr.bf16.mxu0 %v4086_v63  ;;  %805 = vmatprep.subr.bf16.mxu1 %v4088_v0  ;;  %v4179_v63 = vld [vmem:[#allocation5 + $0x90] ss:$8 sps:$4 sm:$0xff]   ;;  %v4184_v0 = vld [vmem:[#allocation5 + $0x184] ss:$8 sps:$4 sm:$0xff]  }
 0x12a   :  { %765 = vmatpush2.bf16.msra.mxu0 %v4090_v1  ;;  %806 = vmatpush2.bf16.msra.mxu1 %v4091_v2  ;;  %v4182_v1 = vld [vmem:[#allocation5 + $0x180] ss:$8 sps:$4 sm:$0xff]   ;;  %v4187_v2 = vld [vmem:[#allocation5 + $0x84] ss:$8 sps:$4 sm:$0xff]  }
 0x12b   :  { %1261 = vmatprep.subr.bf16.mxu1 %v4094_v3  ;;  %1220 = vmatprep.subr.bf16.mxu0 %v4097_v4  ;;  %v4185_v3 = vld [vmem:[#allocation5 + $0x80] ss:$8 sps:$4 sm:$0xff]   ;;  %v4956_v4 = vmov 0.0  }
 0x12d   :  { %767 = vmatmul.mubr.bf16.vlgmr.msra.gmra.mxu0 %v326_v5  ;;  %808 = vmatmul.mubr.bf16.vlgmr.msra.gmra.mxu1 %v326_v5  ;;  %v4198_v5 = vld [vmem:[#allocation8 + $0x74] ss:$8 sps:$4 sm:$0xff]  }
 0x12e   :  { %1262 = vmatpush1.bf16.msra.mxu1 %v4092_v6  ;;  %1221 = vmatpush1.bf16.msra.mxu0 %v4095_v7  ;;  %v394_v6 = vlaneseq }
 0x12f   :  { %1263 = vmatprep.subr.bf16.mxu1 %v4100_v8  ;;  %1222 = vmatprep.subr.bf16.mxu0 %v4103_v9 }
 0x130   :  { %v5182_v7 = vshrl.u32 %v394_v6, 7  ;;  %v4229_v6 = vld [vmem:[#allocation8 + $0xc0] ss:$8 sps:$4 sm:$0xff]  }
 0x132   :  { %1264 = vmatpush1.bf16.msra.mxu1 %v4098_v10  ;;  %1223 = vmatpush1.bf16.msra.mxu0 %v4101_v11  ;;  %v5185_v8 = vsub.s32 0, %v5182_v7  ;;  %v404_v9 = vsub.s32 2, %v5182_v7  ;;  %v392_v10 = vld [vmem:[%s5392_s1] sm:$0xf]  ;;  %v5192_v11 = vsub.s32 1, %v5182_v7 }
 0x133   :  { %1265 = vmatprep.subr.bf16.mxu1 %v4106_v12  ;;  %1224 = vmatprep.subr.bf16.mxu0 %v4109_v13  ;;  %v408_v12 = vsub.s32 3, %v5182_v7 }
 0x134   :  { %v397_v13 = vrot.slane %v392_v10, %v5185_v8 }
 0x136   :  { %1266 = vmatpush1.bf16.msra.mxu1 %v4104_v14  ;;  %1225 = vmatpush1.bf16.msra.mxu0 %v4107_v15  ;;  %v405_v14 = vrot.slane %v392_v10, %v404_v9  ;;  %v401_v15 = vrot.slane %v392_v10, %v5192_v11 }
 0x137   :  { %1267 = vmatprep.subr.bf16.mxu1 %v4112_v16  ;;  %1226 = vmatprep.subr.bf16.mxu0 %v4115_v17  ;;  %v409_v16 = vrot.slane %v392_v10, %v408_v12  ;;  %v4234_v10 = vld [vmem:[#allocation8 + $0xb4] ss:$8 sps:$4 sm:$0xff]  }
 0x13a   :  { %1268 = vmatpush1.bf16.msra.mxu1 %v4110_v18  ;;  %1227 = vmatpush1.bf16.msra.mxu0 %v4113_v19 }
 0x13b   :  { %1269 = vmatprep.subr.bf16.mxu1 %v4118_v20  ;;  %1228 = vmatprep.subr.bf16.mxu0 %v4121_v21 }
 0x13e   :  { %1270 = vmatpush1.bf16.msra.mxu1 %v4116_v22  ;;  %1229 = vmatpush1.bf16.msra.mxu0 %v4119_v23 }
 0x13f   :  { %1271 = vmatprep.subr.bf16.mxu1 %v4124_v24  ;;  %1230 = vmatprep.subr.bf16.mxu0 %v4127_v25 }
 0x142   :  { %1272 = vmatpush1.bf16.msra.mxu1 %v4122_v26  ;;  %1231 = vmatpush1.bf16.msra.mxu0 %v4125_v27 }
 0x143   :  { %1273 = vmatprep.subr.bf16.mxu1 %v4130_v28  ;;  %1232 = vmatprep.subr.bf16.mxu0 %v4133_v29 }
 0x146   :  { %1274 = vmatpush1.bf16.msra.mxu1 %v4128_v30  ;;  %1233 = vmatpush1.bf16.msra.mxu0 %v4131_v31 }
 0x147   :  { %1275 = vmatprep.subr.bf16.mxu1 %v4136_v32  ;;  %1234 = vmatprep.subr.bf16.mxu0 %v4139_v33 }
 0x14a   :  { %1276 = vmatpush1.bf16.msra.mxu1 %v4134_v34  ;;  %1235 = vmatpush1.bf16.msra.mxu0 %v4137_v35 }
 0x14b   :  { %1277 = vmatprep.subr.bf16.mxu1 %v4142_v36  ;;  %1236 = vmatprep.subr.bf16.mxu0 %v4145_v37  ;;  %v4188_v36 = vld [vmem:[#allocation11 + $0x38] sm:$0xff]  }
 0x14e   :  { %1278 = vmatpush2.bf16.msra.mxu1 %v4140_v38  ;;  %1237 = vmatpush2.bf16.msra.mxu0 %v4143_v39  ;;  %v4196_v38 = vld [vmem:[#allocation8 + $0x70] ss:$8 sps:$4 sm:$0xff]   ;;  %v4201_v39 = vld [vmem:[#allocation8 + $0x64] ss:$8 sps:$4 sm:$0xff]  }
 0x14f   :  { %1279 = vmatprep.subr.bf16.mxu1 %v4148_v40  ;;  %1238 = vmatprep.subr.bf16.mxu0 %v4151_v41  ;;  %v4189_v40 = vld [vmem:[#allocation11 + $0x30] sm:$0xff]   ;;  %v4199_v41 = vld [vmem:[#allocation8 + $0x60] ss:$8 sps:$4 sm:$0xff]  }
 0x152   :  { %1280 = vmatpush2.bf16.msra.mxu1 %v4146_v42  ;;  %1239 = vmatpush2.bf16.msra.mxu0 %v4149_v43  ;;  %v4204_v42 = vld [vmem:[#allocation8 + $0x54] ss:$8 sps:$4 sm:$0xff]   ;;  %v4190_v43 = vld [vmem:[#allocation11 + $0x28] sm:$0xff]  }
 0x153   :  { %1281 = vmatprep.subr.bf16.mxu1 %v4154_v44  ;;  %1240 = vmatprep.subr.bf16.mxu0 %v4157_v45  ;;  %v4202_v44 = vld [vmem:[#allocation8 + $0x50] ss:$8 sps:$4 sm:$0xff]   ;;  %v4207_v45 = vld [vmem:[#allocation8 + $0x44] ss:$8 sps:$4 sm:$0xff]  }
 0x156   :  { %1282 = vmatpush2.bf16.msra.mxu1 %v4152_v46  ;;  %1241 = vmatpush2.bf16.msra.mxu0 %v4155_v47  ;;  %v4191_v46 = vld [vmem:[#allocation11 + $0x20] sm:$0xff]  }
 0x157   :  { %1283 = vmatprep.subr.bf16.mxu1 %v4160_v48  ;;  %1242 = vmatprep.subr.bf16.mxu0 %v4163_v49  ;;  %v4205_v47 = vld [vmem:[#allocation8 + $0x40] ss:$8 sps:$4 sm:$0xff]   ;;  %v4210_v48 = vld [vmem:[#allocation8 + $0x34] ss:$8 sps:$4 sm:$0xff]  }
 0x158   :  { %v4192_v49 = vld [vmem:[#allocation11 + $0x18] sm:$0xff]  }
 0x15a   :  { %1284 = vmatpush2.bf16.msra.mxu1 %v4158_v50  ;;  %1243 = vmatpush2.bf16.msra.mxu0 %v4161_v51  ;;  %v4208_v50 = vld [vmem:[#allocation8 + $0x30] ss:$8 sps:$4 sm:$0xff]   ;;  %v4213_v51 = vld [vmem:[#allocation8 + $0x24] ss:$8 sps:$4 sm:$0xff]  }
 0x15b   :  { %1285 = vmatprep.subr.bf16.mxu1 %v4166_v52  ;;  %1244 = vmatprep.subr.bf16.mxu0 %v4169_v53  ;;  %v4193_v52 = vld [vmem:[#allocation11 + $0x10] sm:$0xff]   ;;  %v4211_v53 = vld [vmem:[#allocation8 + $0x20] ss:$8 sps:$4 sm:$0xff]  }
 0x15e   :  { %1286 = vmatpush2.bf16.msra.mxu1 %v4164_v54  ;;  %1245 = vmatpush2.bf16.msra.mxu0 %v4167_v55  ;;  %v4216_v54 = vld [vmem:[#allocation8 + $0x14] ss:$8 sps:$4 sm:$0xff]   ;;  %v4194_v55 = vld [vmem:[#allocation11 + $0x8] sm:$0xff]  }
 0x15f   :  { %1287 = vmatprep.subr.bf16.mxu1 %v4172_v56  ;;  %1246 = vmatprep.subr.bf16.mxu0 %v4175_v57  ;;  %v4214_v56 = vld [vmem:[#allocation8 + $0x10] ss:$8 sps:$4 sm:$0xff]   ;;  %v4219_v57 = vld [vmem:[#allocation8 + $0x4] ss:$8 sps:$4 sm:$0xff]  }
 0x162   :  { %1288 = vmatpush2.bf16.msra.mxu1 %v4170_v58  ;;  %1247 = vmatpush2.bf16.msra.mxu0 %v4173_v59  ;;  %v4195_v58 = vld [vmem:[#allocation11] sm:$0xff]   ;;  %v314_v59 = vld [vmem:[%s5393_s14] sm:$0x3] }
 0x163   :  { %1289 = vmatprep.subr.bf16.mxu1 %v4178_v60  ;;  %1248 = vmatprep.subr.bf16.mxu0 %v4181_v62  ;;  %v4217_v60 = vld [vmem:[#allocation8] ss:$8 sps:$4 sm:$0xff]   ;;  %v1551_v62 = vpack.c.bf16 %v314_v59, %v314_v59  ;;  %v4260_v59 = vld [vmem:[%s5355_s12 + $0x54] ss:$8 sps:$4 sm:$0xff]  }
 0x166   :  { %1290 = vmatpush2.bf16.msra.mxu1 %v4176_v61  ;;  %1249 = vmatpush2.bf16.msra.mxu0 %v4179_v63  ;;  %v4222_v61 = vld [vmem:[#allocation8 + $0xf4] ss:$8 sps:$4 sm:$0xff]   ;;  %v4220_v63 = vld [vmem:[#allocation8 + $0xf0] ss:$8 sps:$4 sm:$0xff]  }
 0x167   :  { %1291 = vmatprep.subr.bf16.mxu1 %v4184_v0  ;;  %1250 = vmatprep.subr.bf16.mxu0 %v4187_v2  ;;  %v4225_v0 = vld [vmem:[#allocation8 + $0xe4] ss:$8 sps:$4 sm:$0xff]   ;;  %v4228_v2 = vld [vmem:[#allocation8 + $0xd4] ss:$8 sps:$4 sm:$0xff]  }
 0x16a   :  { %1292 = vmatpush2.bf16.msra.mxu1 %v4182_v1  ;;  %1251 = vmatpush2.bf16.msra.mxu0 %v4185_v3  ;;  %v4223_v1 = vld [vmem:[#allocation8 + $0xe0] ss:$8 sps:$4 sm:$0xff]   ;;  %v4226_v3 = vld [vmem:[#allocation8 + $0xd0] ss:$8 sps:$4 sm:$0xff]  }
 0x16b   :  { %3908 = vmatprep.subr.bf16.mxu1 %v4956_v4  ;;  %1510 = vmatprep.subr.bf16.mxu0 %v4198_v5  ;;  %v4231_v5 = vld [vmem:[#allocation8 + $0xc4] ss:$8 sps:$4 sm:$0xff]  }
 0x1ed   :  { %v768_v17 = vpop.f32.mrf.mxu0  ;;  %v809_v18 = vpop.f32.mrf.mxu1 }
 0x1ee   :  { %v769_v19 = vadd.f32 %v768_v17, %v397_v13  ;;  %v810_v20 = vadd.f32 %v809_v18, %v405_v14  ;;  %v4232_v13 = vld [vmem:[#allocation8 + $0xb0] ss:$8 sps:$4 sm:$0xff]   ;;  %v4237_v14 = vld [vmem:[#allocation8 + $0xa4] ss:$8 sps:$4 sm:$0xff]  }
 0x1ef   :  { %v770_v21 = vpop.f32.mrf.mxu0  ;;  %v811_v22 = vpop.f32.mrf.mxu1  ;;  %v4238_v17 = vld [vmem:[#allocation8 + $0x90] ss:$8 sps:$4 sm:$0xff]  }
 0x1f0   :  { %v816_v23 = vmax.f32 %v769_v19, 0.0  ;;  %v771_v24 = vadd.f32 %v770_v21, %v401_v15  ;;  %v812_v25 = vadd.f32 %v811_v22, %v409_v16  ;;  %v818_v26 = vmax.f32 %v810_v20, 0.0  ;;  %v4235_v15 = vld [vmem:[#allocation8 + $0xa0] ss:$8 sps:$4 sm:$0xff]   ;;  %v4240_v16 = vld [vmem:[#allocation8 + $0x94] ss:$8 sps:$4 sm:$0xff]  }
 0x1f1   :  { %v813_v27 = vpop.f32.mrf.mxu1  ;;  %v772_v28 = vpop.f32.mrf.mxu0  ;;  %v4241_v18 = vld [vmem:[%s5394_s3 + $0x38] sm:$0xff]   ;;  %v4244_v19 = vld [vmem:[#allocation8 + $0x84] ss:$8 sps:$4 sm:$0xff]   ;;  %v4242_v20 = vld [vmem:[#allocation8 + $0x80] ss:$8 sps:$4 sm:$0xff]  }
 0x1f2   :  { %v817_v29 = vmax.f32 %v771_v24, 0.0  ;;  %v819_v30 = vmax.f32 %v812_v25, 0.0  ;;  %v820_v31 = vpack.c.bf16 %v816_v23, %v816_v23  ;;  %v822_v37 = vpack.c.bf16 %v818_v26, %v818_v26  ;;  %v4245_v21 = vld [vmem:[%s5394_s3 + $0x30] sm:$0xff]   ;;  %v4246_v22 = vld [vmem:[%s5394_s3 + $0x28] sm:$0xff]   ;;  %v4247_v23 = vld [vmem:[%s5394_s3 + $0x20] sm:$0xff]  }
 0x1f3   :  { %v814_v32 = vpop.f32.mrf.mxu1  ;;  %v773_v33 = vpop.f32.mrf.mxu0  ;;  %v4248_v24 = vld [vmem:[%s5394_s3 + $0x18] sm:$0xff]   ;;  %v4249_v25 = vld [vmem:[%s5394_s3 + $0x10] sm:$0xff]   ;;  %v4250_v26 = vld [vmem:[%s5394_s3 + $0x8] sm:$0xff]  }
 0x1f4   :  { %v821_v34 = vpack.c.bf16 %v817_v29, %v817_v29  ;;  %v823_v35 = vpack.c.bf16 %v819_v30, %v819_v30  ;;  %v4251_v27 = vld [vmem:[%s5394_s3] sm:$0xff]   ;;  %v4254_v28 = vld [vmem:[%s5355_s12 + $0x74] ss:$8 sps:$4 sm:$0xff]  }
 0x1f5   :  { %v888_v29 = vld [vmem:[#allocation7] sm:$0x3] }
 0x1f6   :  { %1252 = vmatprep.mubr.bf16.mxu0 %v821_v34  ;;  %1293 = vmatprep.mubr.bf16.mxu1 %v823_v35  ;;  %v893_v30 = vrot.slane %v888_v29, %v5185_v8 }
 0x1f7   :  { %1253 = vmatmul.mubr.bf16.vlgmr.msra.gmra.mxu0 %v820_v31  ;;  %1294 = vmatmul.mubr.bf16.vlgmr.msra.gmra.mxu1 %v822_v37  ;;  %v897_v31 = vrot.slane %v888_v29, %v5192_v11  ;;  %v3657_v29 = vld [vmem:[#allocation13] ss:$0 sm:$0xff] }
 0x1f8   :  { %3909 = vmatpush3.bf16.msra.mxu1 %v4188_v36  ;;  %3924 = vmatprep.mubr.msk.bf16.mxu1 %vm4957_vm0, %v4956_v4 }
 0x1f9   :  { %3910 = vmatprep.subr.bf16.mxu1 %v4956_v4  ;;  %1511 = vmatpush1.bf16.msra.mxu0 %v4196_v38 }
 0x1fa   :  { %1512 = vmatprep.subr.bf16.mxu0 %v4201_v39 }
 0x1fc   :  { %3911 = vmatpush3.bf16.msra.mxu1 %v4189_v40 }
 0x1fd   :  { %3912 = vmatprep.subr.bf16.mxu1 %v4956_v4  ;;  %1513 = vmatpush1.bf16.msra.mxu0 %v4199_v41 }
 0x1fe   :  { %1514 = vmatprep.subr.bf16.mxu0 %v4204_v42 }
 0x200   :  { %3913 = vmatpush3.bf16.msra.mxu1 %v4190_v43 }
 0x201   :  { %3914 = vmatprep.subr.bf16.mxu1 %v4956_v4  ;;  %1515 = vmatpush1.bf16.msra.mxu0 %v4202_v44 }
 0x202   :  { %1516 = vmatprep.subr.bf16.mxu0 %v4207_v45 }
 0x204   :  { %3915 = vmatpush3.bf16.msra.mxu1 %v4191_v46 }
 0x205   :  { %3916 = vmatprep.subr.bf16.mxu1 %v4956_v4  ;;  %1517 = vmatpush1.bf16.msra.mxu0 %v4205_v47 }
 0x206   :  { %1518 = vmatprep.subr.bf16.mxu0 %v4210_v48  ;;  %v3648_v48 = vld [vmem:[%s5395_s10] ss:$0 sm:$0xff] }
 0x208   :  { %3917 = vmatpush3.bf16.msra.mxu1 %v4192_v49 }
 0x209   :  { %3918 = vmatprep.subr.bf16.mxu1 %v4956_v4  ;;  %1519 = vmatpush1.bf16.msra.mxu0 %v4208_v50 }
 0x20a   :  { %1520 = vmatprep.subr.bf16.mxu0 %v4213_v51 }
 0x20c   :  { %3919 = vmatpush3.bf16.msra.mxu1 %v4193_v52 }
 0x20d   :  { %3920 = vmatprep.subr.bf16.mxu1 %v4956_v4  ;;  %1521 = vmatpush1.bf16.msra.mxu0 %v4211_v53 }
 0x20e   :  { %1522 = vmatprep.subr.bf16.mxu0 %v4216_v54  ;;  %v4252_v54 = vld [vmem:[%s5355_s12 + $0x70] ss:$8 sps:$4 sm:$0xff]  }
 0x210   :  { %3921 = vmatpush3.bf16.msra.mxu1 %v4194_v55 }
 0x211   :  { %3922 = vmatprep.subr.bf16.mxu1 %v4956_v4  ;;  %1523 = vmatpush1.bf16.msra.mxu0 %v4214_v56  ;;  %v4257_v56 = vld [vmem:[%s5355_s12 + $0x64] ss:$8 sps:$4 sm:$0xff]  }
 0x212   :  { %1524 = vmatprep.subr.bf16.mxu0 %v4219_v57 }
 0x214   :  { %3923 = vmatpush3.bf16.msra.mxu1 %v4195_v58  ;;  %v4255_v58 = vld [vmem:[%s5355_s12 + $0x60] ss:$8 sps:$4 sm:$0xff]  }
 0x215   :  { %1525 = vmatpush1.bf16.msra.mxu0 %v4217_v60  ;;  %3928 = vmatprep.subr.bf16.mxu1 %v4956_v4  ;;  %v4258_v60 = vld [vmem:[%s5355_s12 + $0x50] ss:$8 sps:$4 sm:$0xff]  }
 0x216   :  { %1526 = vmatprep.subr.bf16.mxu0 %v4222_v61  ;;  %v4263_v61 = vld [vmem:[%s5355_s12 + $0x44] ss:$8 sps:$4 sm:$0xff]  }
 0x217   :  { %3925 = vmatmul.mubr.bf16.vlgmr.msra.gmra.mxu1 %v1551_v62  ;;  %v4261_v62 = vld [vmem:[%s5355_s12 + $0x40] ss:$8 sps:$4 sm:$0xff]  }
 0x218   :  { %3944 = vmatprep.mubr.msk.bf16.mxu1 %vm4957_vm0, %v4956_v4  ;;  %3929 = vmatpush3.bf16.msra.mxu1 %v4241_v18  ;;  %v1338_v18 = vld [vmem:[#allocation10] sm:$0x3] }
 0x219   :  { %1527 = vmatpush2.bf16.msra.mxu0 %v4220_v63  ;;  %3930 = vmatprep.subr.bf16.mxu1 %v4956_v4  ;;  %v4266_v63 = vld [vmem:[%s5355_s12 + $0x34] ss:$8 sps:$4 sm:$0xff]  }
 0x21a   :  { %1528 = vmatprep.subr.bf16.mxu0 %v4225_v0  ;;  %v4264_v0 = vld [vmem:[%s5355_s12 + $0x30] ss:$8 sps:$4 sm:$0xff]  }
 0x21c   :  { %3931 = vmatpush3.bf16.msra.mxu1 %v4245_v21 }
 0x21d   :  { %1529 = vmatpush2.bf16.msra.mxu0 %v4223_v1  ;;  %3932 = vmatprep.subr.bf16.mxu1 %v4956_v4  ;;  %v4269_v1 = vld [vmem:[%s5355_s12 + $0x24] ss:$8 sps:$4 sm:$0xff]  }
 0x21e   :  { %1530 = vmatprep.subr.bf16.mxu0 %v4228_v2  ;;  %v4267_v2 = vld [vmem:[%s5355_s12 + $0x20] ss:$8 sps:$4 sm:$0xff]  }
 0x220   :  { %3933 = vmatpush3.bf16.msra.mxu1 %v4246_v22 }
 0x221   :  { %1531 = vmatpush2.bf16.msra.mxu0 %v4226_v3  ;;  %3934 = vmatprep.subr.bf16.mxu1 %v4956_v4  ;;  %v4272_v3 = vld [vmem:[%s5355_s12 + $0x14] ss:$8 sps:$4 sm:$0xff]  }
 0x222   :  { %1532 = vmatprep.subr.bf16.mxu0 %v4231_v5  ;;  %v4270_v5 = vld [vmem:[%s5355_s12 + $0x10] ss:$8 sps:$4 sm:$0xff]  }
 0x224   :  { %3935 = vmatpush3.bf16.msra.mxu1 %v4247_v23 }
 0x225   :  { %1533 = vmatpush2.bf16.msra.mxu0 %v4229_v6  ;;  %3936 = vmatprep.subr.bf16.mxu1 %v4956_v4  ;;  %v4275_v6 = vld [vmem:[%s5355_s12 + $0x4] ss:$8 sps:$4 sm:$0xff]  }
 0x226   :  { %1534 = vmatprep.subr.bf16.mxu0 %v4234_v10  ;;  %v4273_v10 = vld [vmem:[%s5355_s12] ss:$8 sps:$4 sm:$0xff]  }
 0x228   :  { %3937 = vmatpush3.bf16.msra.mxu1 %v4248_v24 }
 0x229   :  { %1535 = vmatpush2.bf16.msra.mxu0 %v4232_v13  ;;  %3938 = vmatprep.subr.bf16.mxu1 %v4956_v4  ;;  %v4958_v13 = vmov 0  }
 0x22a   :  { %1536 = vmatprep.subr.bf16.mxu0 %v4237_v14  ;;  %v4276_v14 = vld [vmem:[#allocation14 + $0x10] ss:$8 sps:$4 sm:$0xff]  }
 0x22c   :  { %3939 = vmatpush3.bf16.msra.mxu1 %v4249_v25 }
 0x22d   :  { %1537 = vmatpush2.bf16.msra.mxu0 %v4235_v15  ;;  %3940 = vmatprep.subr.bf16.mxu1 %v4956_v4  ;;  %v4278_v15 = vld [vmem:[#allocation14 + $0x14] ss:$8 sps:$4 sm:$0xff]  }
 0x22e   :  { %1538 = vmatprep.subr.bf16.mxu0 %v4240_v16  ;;  %v4281_v16 = vld [vmem:[#allocation14 + $0x4] ss:$8 sps:$4 sm:$0xff]  }
 0x230   :  { %3941 = vmatpush3.bf16.msra.mxu1 %v4250_v26 }
 0x231   :  { %1539 = vmatpush2.bf16.msra.mxu0 %v4238_v17  ;;  %3942 = vmatprep.subr.bf16.mxu1 %v4956_v4  ;;  %v4279_v17 = vld [vmem:[#allocation14] ss:$8 sps:$4 sm:$0xff]  }
 0x232   :  { %1540 = vmatprep.subr.bf16.mxu0 %v4244_v19  ;;  %v1343_v19 = vrot.slane %v1338_v18, %v5185_v8 }
 0x234   :  { %3943 = vmatpush3.bf16.msra.mxu1 %v4251_v27 }
 0x235   :  { %1541 = vmatpush2.bf16.msra.mxu0 %v4242_v20  ;;  %1944 = vmatprep.subr.bf16.mxu1 %v4254_v28  ;;  %v1347_v20 = vrot.slane %v1338_v18, %v5192_v11 }
 0x236   :  { %1835 = vmatprep.subr.bf16.mxu0 %v4278_v15 }
 0x2b7   :  { %v1254_v32 = vpop.f32.mrf.mxu0  ;;  %v1295_v33 = vpop.f32.mrf.mxu1 }
 0x2b8   :  { %v1255_v34 = vadd.f32 %v1254_v32, %v893_v30 }
 0x2b9   :  { %v1256_v35 = vpop.f32.mrf.mxu0  ;;  %v1297_v36 = vpop.f32.mrf.mxu1 }
 0x2ba   :  { %v1296_v37 = vadd.f32 %v1295_v33, %v1255_v34  ;;  %v1257_v38 = vadd.f32 %v1256_v35, %v897_v31 }
 0x2bb   :  { %v1299_v39 = vpop.f32.mrf.mxu1  ;;  %v1258_v40 = vpop.f32.mrf.mxu0 }
 0x2bc   :  { %v1298_v41 = vadd.f32 %v1297_v36, %v1257_v38  ;;  %v1302_v42 = vmax.f32 %v1296_v37, 0.0  ;;  %v4282_v37 = vld [vmem:[#allocation17 + $0x78] sm:$0xff]   ;;  %v4284_v39 = vld [vmem:[#allocation17 + $0x70] sm:$0xff]  }
 0x2bd   :  { %v1300_v43 = vpop.f32.mrf.mxu1  ;;  %v1259_v44 = vpop.f32.mrf.mxu0  ;;  %v4283_v38 = vld [vmem:[#allocation17 + $0x38] sm:$0xff]   ;;  %v4285_v40 = vld [vmem:[#allocation17 + $0x30] sm:$0xff]  }
 0x2be   :  { %v1303_v45 = vmax.f32 %v1298_v41, 0.0  ;;  %v1304_v47 = vpack.c.bf16 %v1302_v42, %v1302_v42  ;;  %v4286_v41 = vld [vmem:[#allocation17 + $0x68] sm:$0xff]   ;;  %v4288_v43 = vld [vmem:[#allocation17 + $0x60] sm:$0xff]  }
 0x2bf   :  { %v4287_v42 = vld [vmem:[#allocation17 + $0x28] sm:$0xff]   ;;  %v4289_v44 = vld [vmem:[#allocation17 + $0x20] sm:$0xff]  }
 0x2c0   :  { %v1305_v46 = vpack.c.bf16 %v1303_v45, %v1303_v45  ;;  %v4290_v45 = vld [vmem:[#allocation17 + $0x58] sm:$0xff]  }
 0x2c2   :  { %1542 = vmatprep.mubr.bf16.mxu0 %v1305_v46  ;;  %v4291_v46 = vld [vmem:[#allocation17 + $0x18] sm:$0xff]  }
 0x2c3   :  { %1543 = vmatmul.mubr.bf16.vlgmr.msra.gmra.mxu0 %v1304_v47  ;;  %v4292_v47 = vld [vmem:[#allocation17 + $0x50] sm:$0xff]  }
 0x2c4   :  { %1855 = vmatprep.mubr.bf16.mxu0 %v4958_v13  ;;  %1836 = vmatpush1.bf16.msra.mxu0 %v4276_v14 }
 0x2c5   :  { %1837 = vmatprep.subr.bf16.mxu0 %v4281_v16 }
 0x2c8   :  { %1838 = vmatpush1.bf16.msra.mxu0 %v4279_v17 }
 0x2c9   :  { %3877 = vmatprep.subr.bf16.mxu0 %v4282_v37  ;;  %v4324_v37 = vld [vmem:[#allocation26 + $0xec] ss:$16 sps:$4 sm:$0xff]  }
 0x2d7   :  { %v1657_v49 = vpop.f32.mrf.mxu1 }
 0x2d8   :  { %v1658_v50 = vadd.f32 %v3648_v48, %v1657_v49  ;;  %v4293_v48 = vld [vmem:[#allocation17 + $0x10] sm:$0xff]   ;;  %v4294_v49 = vld [vmem:[#allocation17 + $0x48] sm:$0xff]  }
 0x2d9   :  { %v3926_v51 = vpop.f32.mrf.mxu1 }
 0x2da   :  { %v1663_v52 = vmax.f32 %v1658_v50, 0.0  ;;  %v4295_v50 = vld [vmem:[#allocation17 + $0x8] sm:$0xff]   ;;  %v4296_v51 = vld [vmem:[#allocation17 + $0x40] sm:$0xff]  }
 0x2db   :  { %v1660_v53 = vpop.f32.mrf.mxu1 }
 0x2dc   :  { %v1664_v55 = vpack.c.bf16 %v1663_v52, %v1663_v52  ;;  %v4297_v52 = vld [vmem:[#allocation17] sm:$0xff]  }
 0x2dd   :  { %v3927_v57 = vpop.f32.mrf.mxu1  ;;  %v4300_v53 = vld [vmem:[#allocation23 + $0x74] ss:$8 sps:$4 sm:$0xff]  }
 0x2de   :  { %3945 = vmatmul.mubr.bf16.vlgmr.msra.gmra.mxu1 %v1664_v55  ;;  %v4329_v55 = vld [vmem:[#allocation20 + $0x30] sm:$0xff]   ;;  %v4337_v57 = vld [vmem:[#allocation20 + $0x20] sm:$0xff]  }
 0x2df   :  { %1945 = vmatpush1.bf16.msra.mxu1 %v4252_v54  ;;  %1976 = vmatprep.mubr.bf16.mxu1 %v4958_v13  ;;  %v4325_v54 = vld [vmem:[#allocation20 + $0x38] sm:$0xff]  }
 0x2e0   :  { %1946 = vmatprep.subr.bf16.mxu1 %v4257_v56  ;;  %v4333_v56 = vld [vmem:[#allocation20 + $0x28] sm:$0xff]  }
 0x2e3   :  { %1947 = vmatpush1.bf16.msra.mxu1 %v4255_v58  ;;  %v4341_v58 = vld [vmem:[#allocation20 + $0x18] sm:$0xff]  }
 0x2e4   :  { %1948 = vmatprep.subr.bf16.mxu1 %v4260_v59  ;;  %v4345_v59 = vld [vmem:[#allocation20 + $0x10] sm:$0xff]  }
 0x2e7   :  { %1949 = vmatpush1.bf16.msra.mxu1 %v4258_v60 }
 0x2e8   :  { %1950 = vmatprep.subr.bf16.mxu1 %v4263_v61 }
 0x2eb   :  { %1951 = vmatpush1.bf16.msra.mxu1 %v4261_v62 }
 0x2ec   :  { %1952 = vmatprep.subr.bf16.mxu1 %v4266_v63 }
 0x2ef   :  { %1953 = vmatpush1.bf16.msra.mxu1 %v4264_v0  ;;  %v1985_v0 = vld [vmem:[#allocation16] sm:$0x3] }
 0x2f0   :  { %1954 = vmatprep.subr.bf16.mxu1 %v4269_v1  ;;  %v1990_v1 = vrot.slane %v1985_v0, %v5185_v8 }
 0x2f3   :  { %1955 = vmatpush1.bf16.msra.mxu1 %v4267_v2 }
 0x2f4   :  { %1956 = vmatprep.subr.bf16.mxu1 %v4272_v3 }
 0x2f7   :  { %1957 = vmatpush1.bf16.msra.mxu1 %v4270_v5  ;;  %v1994_v5 = vrot.slane %v1985_v0, %v5192_v11  ;;  %v4384_v0 = vld [vmem:[#allocation26 + $0x148] ss:$16 sps:$4 sm:$0xff]  }
 0x2f8   :  { %1958 = vmatprep.subr.bf16.mxu1 %v4275_v6 }
 0x2fb   :  { %1959 = vmatpush1.bf16.msra.mxu1 %v4273_v10 }
 0x2fc   :  { %3948 = vmatprep.subr.bf16.mxu1 %v4956_v4 }
 0x383   :  { %v1544_v21 = vpop.f32.mrf.mxu0 }
 0x384   :  { %v1545_v22 = vadd.f32 %v1544_v21, %v1343_v19  ;;  %v4298_v21 = vld [vmem:[#allocation23 + $0x70] ss:$8 sps:$4 sm:$0xff]  }
 0x385   :  { %v1546_v23 = vpop.f32.mrf.mxu0 }
 0x386   :  { %v5305_v24 = vpack.c.bf16 %v1545_v22, %v1545_v22  ;;  %v1547_v25 = vadd.f32 %v1546_v23, %v1347_v20  ;;  %v4303_v23 = vld [vmem:[#allocation23 + $0x64] ss:$8 sps:$4 sm:$0xff]  }
 0x387   :  { %v1548_v26 = vpop.f32.mrf.mxu0 }
 0x388   :  { %v3445_v27 = vcombine.low %v1545_v22, %v1547_v25  ;;  %1977 = vmatmul.mubr.bf16.vlgmr.msra.gmra.mxu1 %v5305_v24  ;;  %v4301_v25 = vld [vmem:[#allocation23 + $0x60] ss:$8 sps:$4 sm:$0xff]   ;;  %v4306_v26 = vld [vmem:[#allocation23 + $0x54] ss:$8 sps:$4 sm:$0xff]  }
 0x389   :  { %v1549_v28 = vpop.f32.mrf.mxu0  ;;  %3964 = vmatprep.mubr.msk.bf16.mxu1 %vm4957_vm0, %v4956_v4  ;;  %3949 = vmatpush3.bf16.msra.mxu1 %v4325_v54  ;;  %v4356_v54 = vld [vmem:[#allocation26 + $0x1ec] ss:$16 sps:$4 sm:$0xff]  }
 0x38a   :  { %3858 = vst.sshfl [vmem:[%s5370_s27] sm:$0x33 pattern:$0x76325410] %v3445_v27  ;;  %3950 = vmatprep.subr.bf16.mxu1 %v4956_v4  ;;  %v4304_v27 = vld [vmem:[#allocation23 + $0x50] ss:$8 sps:$4 sm:$0xff]  }
 0x38b   :  { %v4309_v28 = vld [vmem:[#allocation23 + $0x44] ss:$8 sps:$4 sm:$0xff]  }
 0x38d   :  { %3951 = vmatpush3.bf16.msra.mxu1 %v4329_v55  ;;  %v4354_v55 = vld [vmem:[#allocation26 + $0x1e8] ss:$16 sps:$4 sm:$0xff]  }
 0x38e   :  { %3952 = vmatprep.subr.bf16.mxu1 %v4956_v4 }
 0x391   :  { %3953 = vmatpush3.bf16.msra.mxu1 %v4333_v56  ;;  %v4359_v56 = vld [vmem:[#allocation26 + $0xe4] ss:$16 sps:$4 sm:$0xff]  }
 0x392   :  { %3954 = vmatprep.subr.bf16.mxu1 %v4956_v4 }
 0x395   :  { %3955 = vmatpush3.bf16.msra.mxu1 %v4337_v57  ;;  %v4360_v57 = vld [vmem:[#allocation26 + $0x1c8] ss:$16 sps:$4 sm:$0xff]  }
 0x396   :  { %3956 = vmatprep.subr.bf16.mxu1 %v4956_v4 }
 0x399   :  { %3957 = vmatpush3.bf16.msra.mxu1 %v4341_v58  ;;  %v4362_v58 = vld [vmem:[#allocation26 + $0x1cc] ss:$16 sps:$4 sm:$0xff]  }
 0x39a   :  { %3958 = vmatprep.subr.bf16.mxu1 %v4956_v4 }
 0x39d   :  { %3959 = vmatpush3.bf16.msra.mxu1 %v4345_v59  ;;  %v4366_v59 = vld [vmem:[#allocation26 + $0x1a8] ss:$16 sps:$4 sm:$0xff]  }
 0x39e   :  { %v1770_v30 = vpop.f32.mrf.mxu1  ;;  %3960 = vmatprep.subr.bf16.mxu1 %v4956_v4 }
 0x39f   :  { %v1771_v31 = vadd.f32 %v3657_v29, %v1770_v30  ;;  %v4307_v29 = vld [vmem:[#allocation23 + $0x40] ss:$8 sps:$4 sm:$0xff]   ;;  %v4312_v30 = vld [vmem:[#allocation23 + $0x34] ss:$8 sps:$4 sm:$0xff]  }
 0x3a0   :  { %v3946_v32 = vpop.f32.mrf.mxu1 }
 0x3a1   :  { %v1776_v33 = vmax.f32 %v1771_v31, 0.0  ;;  %v4310_v31 = vld [vmem:[#allocation23 + $0x30] ss:$8 sps:$4 sm:$0xff]   ;;  %v4315_v32 = vld [vmem:[#allocation23 + $0x24] ss:$8 sps:$4 sm:$0xff]  }
 0x3a2   :  { %v1773_v34 = vpop.f32.mrf.mxu1 }
 0x3a3   :  { %v1794_v35 = vpack.c.bf16 %v1776_v33, %v1776_v33  ;;  %v4313_v33 = vld [vmem:[#allocation23 + $0x20] ss:$8 sps:$4 sm:$0xff]   ;;  %v4318_v34 = vld [vmem:[#allocation23 + $0x14] ss:$8 sps:$4 sm:$0xff]  }
 0x3a4   :  { %v3947_v36 = vpop.f32.mrf.mxu1 }
 0x3a5   :  { %3670 = vmatmul.mubr.msk.bf16.vlgmr.msra.gmra.mxu0 %vm1819_vm1, %v1794_v35  ;;  %v4321_v35 = vld [vmem:[#allocation23 + $0x4] ss:$8 sps:$4 sm:$0xff]   ;;  %v4319_v36 = vld [vmem:[#allocation23] ss:$8 sps:$4 sm:$0xff]  }
 0x3a6   :  { %3878 = vmatpush3.bf16.msra.mxu0 %v4283_v38  ;;  %v4322_v38 = vld [vmem:[#allocation26 + $0xe8] ss:$16 sps:$4 sm:$0xff]  }
 0x3a7   :  { %3879 = vmatprep.subr.bf16.mxu0 %v4284_v39  ;;  %v4328_v39 = vld [vmem:[#allocation26 + $0xcc] ss:$16 sps:$4 sm:$0xff]  }
 0x3aa   :  { %3880 = vmatpush3.bf16.msra.mxu0 %v4285_v40  ;;  %v4326_v40 = vld [vmem:[#allocation26 + $0xc8] ss:$16 sps:$4 sm:$0xff]  }
 0x3ab   :  { %3881 = vmatprep.subr.bf16.mxu0 %v4286_v41  ;;  %v4332_v41 = vld [vmem:[#allocation26 + $0xac] ss:$16 sps:$4 sm:$0xff]  }
 0x3ae   :  { %3882 = vmatpush3.bf16.msra.mxu0 %v4287_v42  ;;  %v4330_v42 = vld [vmem:[#allocation26 + $0xa8] ss:$16 sps:$4 sm:$0xff]  }
 0x3af   :  { %3883 = vmatprep.subr.bf16.mxu0 %v4288_v43  ;;  %v4336_v43 = vld [vmem:[#allocation26 + $0x8c] ss:$16 sps:$4 sm:$0xff]  }
 0x3b2   :  { %3884 = vmatpush3.bf16.msra.mxu0 %v4289_v44  ;;  %v4334_v44 = vld [vmem:[#allocation26 + $0x88] ss:$16 sps:$4 sm:$0xff]  }
 0x3b3   :  { %3885 = vmatprep.subr.bf16.mxu0 %v4290_v45  ;;  %v4340_v45 = vld [vmem:[#allocation26 + $0x6c] ss:$16 sps:$4 sm:$0xff]  }
 0x3b6   :  { %3886 = vmatpush3.bf16.msra.mxu0 %v4291_v46  ;;  %v4338_v46 = vld [vmem:[#allocation26 + $0x68] ss:$16 sps:$4 sm:$0xff]  }
 0x3b7   :  { %3887 = vmatprep.subr.bf16.mxu0 %v4292_v47  ;;  %v4344_v47 = vld [vmem:[#allocation26 + $0x4c] ss:$16 sps:$4 sm:$0xff]  }
 0x3ba   :  { %3888 = vmatpush3.bf16.msra.mxu0 %v4293_v48  ;;  %v4342_v48 = vld [vmem:[#allocation26 + $0x48] ss:$16 sps:$4 sm:$0xff]  }
 0x3bb   :  { %3889 = vmatprep.subr.bf16.mxu0 %v4294_v49  ;;  %v4348_v49 = vld [vmem:[#allocation26 + $0x2c] ss:$16 sps:$4 sm:$0xff]  }
 0x3be   :  { %3890 = vmatpush3.bf16.msra.mxu0 %v4295_v50  ;;  %v4349_v50 = vld [vmem:[#allocation20 + $0x8] sm:$0xff]  }
 0x3bf   :  { %3891 = vmatprep.subr.bf16.mxu0 %v4296_v51  ;;  %3961 = vmatpush3.bf16.msra.mxu1 %v4349_v50  ;;  %v4352_v51 = vld [vmem:[#allocation26 + $0xc] ss:$16 sps:$4 sm:$0xff]   ;;  %v4426_v50 = vld [vmem:[#allocation28 + $0x170] ss:$8 sps:$4 sm:$0xff]  }
 0x3c0   :  { %3962 = vmatprep.subr.bf16.mxu1 %v4956_v4  ;;  %v4374_v4 = vld [vmem:[#allocation26 + $0x18c] ss:$16 sps:$4 sm:$0xff]  }
 0x3c2   :  { %3892 = vmatpush3.bf16.msra.mxu0 %v4297_v52  ;;  %v4350_v52 = vld [vmem:[#allocation26 + $0x8] ss:$16 sps:$4 sm:$0xff]  }
 0x3c3   :  { %2399 = vmatprep.subr.bf16.mxu0 %v4300_v53  ;;  %v4353_v53 = vld [vmem:[#allocation20] sm:$0xff]  }
 0x3c4   :  { %3963 = vmatpush3.bf16.msra.mxu1 %v4353_v53  ;;  %v4431_v53 = vld [vmem:[#allocation28 + $0x164] ss:$8 sps:$4 sm:$0xff]  }
 0x3c5   :  { %2850 = vmatprep.subr.bf16.mxu1 %v4359_v56  ;;  %v4405_v56 = vld [vmem:[#allocation26 + $0x1c0] ss:$16 sps:$4 sm:$0xff]  }
 0x448   :  { %v1978_v60 = vpop.f32.mrf.mxu1 }
 0x44a   :  { %v1980_v61 = vpop.f32.mrf.mxu1 }
 0x44c   :  { %v1982_v62 = vpop.f32.mrf.mxu1 }
 0x44d   :  { %v4378_v62 = vld [vmem:[#allocation26 + $0x168] ss:$16 sps:$4 sm:$0xff]  }
 0x44e   :  { %v1983_v63 = vpop.f32.mrf.mxu1 }
 0x44f   :  { %v4380_v63 = vld [vmem:[#allocation26 + $0x16c] ss:$16 sps:$4 sm:$0xff]  }
 0x465   :  { %v1857_v2 = vpop.f32.mrf.mxu0 }
 0x466   :  { %v1979_v3 = vadd.f32 %v1978_v60, %v1857_v2  ;;  %v4368_v60 = vld [vmem:[#allocation26 + $0x1ac] ss:$16 sps:$4 sm:$0xff]  }
 0x467   :  { %v1859_v6 = vpop.f32.mrf.mxu0  ;;  %v4392_v2 = vld [vmem:[#allocation26 + $0x12c] ss:$16 sps:$4 sm:$0xff]  }
 0x468   :  { %v1997_v10 = vadd.f32 %v1990_v1, %v1979_v3  ;;  %v1981_v14 = vadd.f32 %v1980_v61, %v1859_v6  ;;  %v4372_v61 = vld [vmem:[#allocation26 + $0x188] ss:$16 sps:$4 sm:$0xff]   ;;  %v4386_v1 = vld [vmem:[#allocation26 + $0x14c] ss:$16 sps:$4 sm:$0xff]  }
 0x469   :  { %v1861_v15 = vpop.f32.mrf.mxu0  ;;  %v4390_v3 = vld [vmem:[#allocation26 + $0x128] ss:$16 sps:$4 sm:$0xff]  }
 0x46a   :  { %v1998_v16 = vadd.f32 %v1994_v5, %v1981_v14  ;;  %v1999_v17 = vmax.f32 %v1997_v10, 0.0  ;;  %v4398_v5 = vld [vmem:[#allocation26 + $0x10c] ss:$16 sps:$4 sm:$0xff]   ;;  %v4396_v6 = vld [vmem:[#allocation26 + $0x108] ss:$16 sps:$4 sm:$0xff]  }
 0x46b   :  { %v1862_v18 = vpop.f32.mrf.mxu0  ;;  %v4428_v10 = vld [vmem:[#allocation28 + $0x174] ss:$8 sps:$4 sm:$0xff]   ;;  %v3687_v15 = vld [vmem:[#allocation19] ss:$0 sm:$0xff] }
 0x46c   :  { %v2000_v19 = vmax.f32 %v1998_v16, 0.0  ;;  %v2001_v22 = vpack.c.bf16 %v1999_v17, %v1999_v17 }
 0x46e   :  { %v2002_v20 = vpack.c.bf16 %v2000_v19, %v2000_v19 }
 0x470   :  { %2170 = vmatprep.mubr.bf16.mxu0 %v2002_v20 }
 0x471   :  { %2171 = vmatmul.mubr.bf16.vlgmr.msra.gmra.mxu0 %v2001_v22  ;;  %v4357_v22 = vld [vmem:[#allocation26 + $0xe0] ss:$16 sps:$4 sm:$0xff]  }
 0x472   :  { %2400 = vmatpush1.bf16.msra.mxu0 %v4298_v21  ;;  %2431 = vmatprep.mubr.bf16.mxu0 %v4958_v13  ;;  %v4316_v13 = vld [vmem:[#allocation23 + $0x10] ss:$8 sps:$4 sm:$0xff]  }
 0x473   :  { %2401 = vmatprep.subr.bf16.mxu0 %v4303_v23 }
 0x476   :  { %2402 = vmatpush1.bf16.msra.mxu0 %v4301_v25  ;;  %v4365_v25 = vld [vmem:[#allocation26 + $0xc4] ss:$16 sps:$4 sm:$0xff]  }
 0x477   :  { %2403 = vmatprep.subr.bf16.mxu0 %v4306_v26  ;;  %v4363_v26 = vld [vmem:[#allocation26 + $0xc0] ss:$16 sps:$4 sm:$0xff]  }
 0x47a   :  { %2404 = vmatpush1.bf16.msra.mxu0 %v4304_v27  ;;  %v4371_v27 = vld [vmem:[#allocation26 + $0xa4] ss:$16 sps:$4 sm:$0xff]  }
 0x47b   :  { %2405 = vmatprep.subr.bf16.mxu0 %v4309_v28  ;;  %v4369_v28 = vld [vmem:[#allocation26 + $0xa0] ss:$16 sps:$4 sm:$0xff]  }
 0x47e   :  { %2406 = vmatpush1.bf16.msra.mxu0 %v4307_v29  ;;  %v4377_v29 = vld [vmem:[#allocation26 + $0x84] ss:$16 sps:$4 sm:$0xff]  }
 0x47f   :  { %2407 = vmatprep.subr.bf16.mxu0 %v4312_v30  ;;  %v4375_v30 = vld [vmem:[#allocation26 + $0x80] ss:$16 sps:$4 sm:$0xff]  }
 0x482   :  { %2408 = vmatpush1.bf16.msra.mxu0 %v4310_v31  ;;  %v4383_v31 = vld [vmem:[#allocation26 + $0x64] ss:$16 sps:$4 sm:$0xff]  }
 0x483   :  { %2409 = vmatprep.subr.bf16.mxu0 %v4315_v32  ;;  %v4381_v32 = vld [vmem:[#allocation26 + $0x60] ss:$16 sps:$4 sm:$0xff]  }
 0x486   :  { %2410 = vmatpush1.bf16.msra.mxu0 %v4313_v33  ;;  %v4389_v33 = vld [vmem:[#allocation26 + $0x44] ss:$16 sps:$4 sm:$0xff]  }
 0x487   :  { %2411 = vmatprep.subr.bf16.mxu0 %v4318_v34  ;;  %v2307_v34 = vld [vmem:[#allocation25] sm:$0x3] }
 0x48a   :  { %2412 = vmatpush1.bf16.msra.mxu0 %v4316_v13  ;;  %v4387_v13 = vld [vmem:[#allocation26 + $0x40] ss:$16 sps:$4 sm:$0xff]  }
 0x48b   :  { %2413 = vmatprep.subr.bf16.mxu0 %v4321_v35  ;;  %v2312_v35 = vrot.slane %v2307_v34, %v5185_v8 }
 0x48e   :  { %2414 = vmatpush1.bf16.msra.mxu0 %v4319_v36  ;;  %v4395_v36 = vld [vmem:[#allocation26 + $0x24] ss:$16 sps:$4 sm:$0xff]  }
 0x48f   :  { %2891 = vmatprep.subr.bf16.mxu0 %v4324_v37  ;;  %v2316_v37 = vrot.slane %v2307_v34, %v5192_v11  ;;  %v4462_v34 = vld [vmem:[#allocation28 + $0x1d0] ss:$8 sps:$4 sm:$0xff]  }
 0x491   :  { %2432 = vmatmul.mubr.bf16.vlgmr.msra.gmra.mxu0 %v5305_v24  ;;  %v4346_v24 = vld [vmem:[#allocation26 + $0x28] ss:$16 sps:$4 sm:$0xff]  }
 0x492   :  { %2892 = vmatpush1.bf16.msra.mxu0 %v4322_v38 }
 0x493   :  { %2893 = vmatprep.subr.bf16.mxu0 %v4328_v39  ;;  %v4393_v39 = vld [vmem:[#allocation26 + $0x20] ss:$16 sps:$4 sm:$0xff]  }
 0x496   :  { %2894 = vmatpush1.bf16.msra.mxu0 %v4326_v40 }
 0x497   :  { %2895 = vmatprep.subr.bf16.mxu0 %v4332_v41  ;;  %v4401_v41 = vld [vmem:[#allocation26 + $0x4] ss:$16 sps:$4 sm:$0xff]  }
 0x49a   :  { %2896 = vmatpush1.bf16.msra.mxu0 %v4330_v42 }
 0x49b   :  { %2897 = vmatprep.subr.bf16.mxu0 %v4336_v43 }
 0x49e   :  { %2898 = vmatpush1.bf16.msra.mxu0 %v4334_v44 }
 0x49f   :  { %2899 = vmatprep.subr.bf16.mxu0 %v4340_v45 }
 0x4a2   :  { %2900 = vmatpush1.bf16.msra.mxu0 %v4338_v46  ;;  %v4399_v46 = vld [vmem:[#allocation26] ss:$16 sps:$4 sm:$0xff]  }
 0x4a3   :  { %2901 = vmatprep.subr.bf16.mxu0 %v4344_v47 }
 0x4a6   :  { %2902 = vmatpush1.bf16.msra.mxu0 %v4342_v48 }
 0x4a7   :  { %2903 = vmatprep.subr.bf16.mxu0 %v4348_v49 }
 0x4aa   :  { %2904 = vmatpush1.bf16.msra.mxu0 %v4346_v24  ;;  %v4404_v24 = vld [vmem:[#allocation26 + $0x1e4] ss:$16 sps:$4 sm:$0xff]  }
 0x4ab   :  { %2905 = vmatprep.subr.bf16.mxu0 %v4352_v51 }
 0x4ae   :  { %2906 = vmatpush1.bf16.msra.mxu0 %v4350_v52  ;;  %v4402_v52 = vld [vmem:[#allocation26 + $0x1e0] ss:$16 sps:$4 sm:$0xff]  }
 0x4af   :  { %2907 = vmatprep.subr.bf16.mxu0 %v4356_v54  ;;  %v4407_v54 = vld [vmem:[#allocation26 + $0x1c4] ss:$16 sps:$4 sm:$0xff]  }
 0x4b2   :  { %2908 = vmatpush2.bf16.msra.mxu0 %v4354_v55  ;;  %v4429_v55 = vld [vmem:[#allocation28 + $0x160] ss:$8 sps:$4 sm:$0xff]  }
 0x4b3   :  { %2909 = vmatprep.subr.bf16.mxu0 %v4362_v58  ;;  %v4410_v58 = vld [vmem:[#allocation26 + $0x1a4] ss:$16 sps:$4 sm:$0xff]  }
 0x4b6   :  { %2910 = vmatpush2.bf16.msra.mxu0 %v4360_v57  ;;  %v4434_v57 = vld [vmem:[#allocation28 + $0x154] ss:$8 sps:$4 sm:$0xff]  }
 0x4b7   :  { %2911 = vmatprep.subr.bf16.mxu0 %v4368_v60  ;;  %v4408_v60 = vld [vmem:[#allocation26 + $0x1a0] ss:$16 sps:$4 sm:$0xff]  }
 0x4ba   :  { %2912 = vmatpush2.bf16.msra.mxu0 %v4366_v59  ;;  %v4432_v59 = vld [vmem:[#allocation28 + $0x150] ss:$8 sps:$4 sm:$0xff]  }
 0x4bb   :  { %2913 = vmatprep.subr.bf16.mxu0 %v4374_v4  ;;  %v4413_v4 = vld [vmem:[#allocation26 + $0x184] ss:$16 sps:$4 sm:$0xff]  }
 0x4be   :  { %2914 = vmatpush2.bf16.msra.mxu0 %v4372_v61  ;;  %v4437_v61 = vld [vmem:[#allocation28 + $0x144] ss:$8 sps:$4 sm:$0xff]  }
 0x4bf   :  { %2915 = vmatprep.subr.bf16.mxu0 %v4380_v63  ;;  %v4411_v63 = vld [vmem:[#allocation26 + $0x180] ss:$16 sps:$4 sm:$0xff]  }
 0x4c2   :  { %2916 = vmatpush2.bf16.msra.mxu0 %v4378_v62  ;;  %v4435_v62 = vld [vmem:[#allocation28 + $0x140] ss:$8 sps:$4 sm:$0xff]  }
 0x4c3   :  { %2917 = vmatprep.subr.bf16.mxu0 %v4386_v1  ;;  %v4416_v1 = vld [vmem:[#allocation26 + $0x164] ss:$16 sps:$4 sm:$0xff]  }
 0x4c6   :  { %2918 = vmatpush2.bf16.msra.mxu0 %v4384_v0  ;;  %v4440_v0 = vld [vmem:[#allocation28 + $0x134] ss:$8 sps:$4 sm:$0xff]  }
 0x4c7   :  { %2919 = vmatprep.subr.bf16.mxu0 %v4392_v2  ;;  %v4438_v2 = vld [vmem:[#allocation28 + $0x130] ss:$8 sps:$4 sm:$0xff]  }
 0x4ca   :  { %2920 = vmatpush2.bf16.msra.mxu0 %v4390_v3  ;;  %v4414_v3 = vld [vmem:[#allocation26 + $0x160] ss:$16 sps:$4 sm:$0xff]  }
 0x4cb   :  { %2921 = vmatprep.subr.bf16.mxu0 %v4398_v5  ;;  %v4443_v5 = vld [vmem:[#allocation28 + $0x124] ss:$8 sps:$4 sm:$0xff]  }
 0x4ce   :  { %2922 = vmatpush2.bf16.msra.mxu0 %v4396_v6  ;;  %v4419_v6 = vld [vmem:[#allocation26 + $0x144] ss:$16 sps:$4 sm:$0xff]  }
 0x4cf   :  { %3377 = vmatprep.subr.bf16.mxu0 %v4428_v10  ;;  %v4441_v10 = vld [vmem:[#allocation28 + $0x120] ss:$8 sps:$4 sm:$0xff]  }
 0x531   :  { %v3893_v14 = vpop.f32.mrf.mxu0 }
 0x533   :  { %v3894_v16 = vpop.f32.mrf.mxu0 }
 0x534   :  { %v3895_v17 = vadd.f32 %v3894_v16, %v3893_v14  ;;  %v4417_v14 = vld [vmem:[#allocation26 + $0x140] ss:$16 sps:$4 sm:$0xff]  }
 0x535   :  { %v3896_v18 = vpop.f32.mrf.mxu0  ;;  %v4420_v16 = vld [vmem:[#allocation26 + $0x120] ss:$16 sps:$4 sm:$0xff]  }
 0x536   :  { %v2173_v19 = vadd.f32 %v3895_v17, %v3687_v15  ;;  %v4422_v15 = vld [vmem:[#allocation26 + $0x124] ss:$16 sps:$4 sm:$0xff]   ;;  %v4423_v18 = vld [vmem:[#allocation26 + $0x100] ss:$16 sps:$4 sm:$0xff]  }
 0x537   :  { %v3897_v20 = vpop.f32.mrf.mxu0  ;;  %v4425_v17 = vld [vmem:[#allocation26 + $0x104] ss:$16 sps:$4 sm:$0xff]  }
 0x538   :  { %v2178_v21 = vmax.f32 %v2173_v19, 0.0  ;;  %v4446_v19 = vld [vmem:[#allocation28 + $0x114] ss:$8 sps:$4 sm:$0xff]   ;;  %v4444_v20 = vld [vmem:[#allocation28 + $0x110] ss:$8 sps:$4 sm:$0xff]  }
 0x53a   :  { %v2179_v23 = vpack.c.bf16 %v2178_v21, %v2178_v21  ;;  %v4449_v21 = vld [vmem:[#allocation28 + $0x104] ss:$8 sps:$4 sm:$0xff]  }
 0x53c   :  { %3965 = vmatmul.mubr.bf16.vlgmr.msra.gmra.mxu1 %v2179_v23  ;;  %v4450_v23 = vld [vmem:[#allocation28 + $0x1f0] ss:$8 sps:$4 sm:$0xff]  }
 0x53d   :  { %2851 = vmatpush1.bf16.msra.mxu1 %v4357_v22  ;;  %v4447_v22 = vld [vmem:[#allocation28 + $0x100] ss:$8 sps:$4 sm:$0xff]  }
 0x53e   :  { %2852 = vmatprep.subr.bf16.mxu1 %v4365_v25  ;;  %v4452_v25 = vld [vmem:[#allocation28 + $0x1f4] ss:$8 sps:$4 sm:$0xff]  }
 0x541   :  { %2853 = vmatpush1.bf16.msra.mxu1 %v4363_v26  ;;  %v4453_v26 = vld [vmem:[#allocation28 + $0x70] ss:$8 sps:$4 sm:$0xff]  }
 0x542   :  { %2854 = vmatprep.subr.bf16.mxu1 %v4371_v27  ;;  %v4455_v27 = vld [vmem:[#allocation28 + $0x74] ss:$8 sps:$4 sm:$0xff]  }
 0x545   :  { %2855 = vmatpush1.bf16.msra.mxu1 %v4369_v28  ;;  %v4458_v28 = vld [vmem:[#allocation28 + $0x1e4] ss:$8 sps:$4 sm:$0xff]  }
 0x546   :  { %2856 = vmatprep.subr.bf16.mxu1 %v4377_v29  ;;  %v4461_v29 = vld [vmem:[#allocation28 + $0x64] ss:$8 sps:$4 sm:$0xff]  }
 0x549   :  { %2857 = vmatpush1.bf16.msra.mxu1 %v4375_v30  ;;  %v4456_v30 = vld [vmem:[#allocation28 + $0x1e0] ss:$8 sps:$4 sm:$0xff]  }
 0x54a   :  { %2858 = vmatprep.subr.bf16.mxu1 %v4383_v31  ;;  %v4459_v31 = vld [vmem:[#allocation28 + $0x60] ss:$8 sps:$4 sm:$0xff]  }
 0x54d   :  { %2859 = vmatpush1.bf16.msra.mxu1 %v4381_v32  ;;  %v4464_v32 = vld [vmem:[#allocation28 + $0x1d4] ss:$8 sps:$4 sm:$0xff]  }
 0x54e   :  { %2860 = vmatprep.subr.bf16.mxu1 %v4389_v33  ;;  %v4467_v33 = vld [vmem:[#allocation28 + $0x54] ss:$8 sps:$4 sm:$0xff]  }
 0x551   :  { %v2433_v38 = vpop.f32.mrf.mxu0  ;;  %2861 = vmatpush1.bf16.msra.mxu1 %v4387_v13  ;;  %v4465_v13 = vld [vmem:[#allocation28 + $0x50] ss:$8 sps:$4 sm:$0xff]  }
 0x552   :  { %v2434_v40 = vadd.f32 %v2433_v38, %v2312_v35  ;;  %2862 = vmatprep.subr.bf16.mxu1 %v4395_v36  ;;  %v4470_v35 = vld [vmem:[#allocation28 + $0x1c4] ss:$8 sps:$4 sm:$0xff]   ;;  %v4471_v38 = vld [vmem:[#allocation28 + $0x40] ss:$8 sps:$4 sm:$0xff]  }
 0x553   :  { %v2435_v42 = vpop.f32.mrf.mxu0  ;;  %v4473_v36 = vld [vmem:[#allocation28 + $0x44] ss:$8 sps:$4 sm:$0xff]  }
 0x554   :  { %v2436_v43 = vadd.f32 %v2435_v42, %v2316_v37  ;;  %v2440_v44 = vmax.f32 %v2434_v40, 0.0  ;;  %v4468_v37 = vld [vmem:[#allocation28 + $0x1c0] ss:$8 sps:$4 sm:$0xff]   ;;  %v4479_v40 = vld [vmem:[#allocation28 + $0x34] ss:$8 sps:$4 sm:$0xff]  }
 0x555   :  { %v2437_v45 = vpop.f32.mrf.mxu0  ;;  %2863 = vmatpush1.bf16.msra.mxu1 %v4393_v39  ;;  %v4476_v39 = vld [vmem:[#allocation28 + $0x1b4] ss:$8 sps:$4 sm:$0xff]   ;;  %v4477_v42 = vld [vmem:[#allocation28 + $0x30] ss:$8 sps:$4 sm:$0xff]  }
 0x556   :  { %v2441_v47 = vmax.f32 %v2436_v43, 0.0  ;;  %2864 = vmatprep.subr.bf16.mxu1 %v4401_v41  ;;  %v2442_v51 = vpack.c.bf16 %v2440_v44, %v2440_v44  ;;  %v4474_v41 = vld [vmem:[#allocation28 + $0x1b0] ss:$8 sps:$4 sm:$0xff]   ;;  %v4482_v43 = vld [vmem:[#allocation28 + $0x1a4] ss:$8 sps:$4 sm:$0xff]  }
 0x557   :  { %v2438_v48 = vpop.f32.mrf.mxu0  ;;  %v4485_v44 = vld [vmem:[#allocation28 + $0x24] ss:$8 sps:$4 sm:$0xff]   ;;  %v4480_v45 = vld [vmem:[#allocation28 + $0x1a0] ss:$8 sps:$4 sm:$0xff]  }
 0x558   :  { %v2443_v49 = vpack.c.bf16 %v2441_v47, %v2441_v47  ;;  %v4488_v47 = vld [vmem:[#allocation28 + $0x194] ss:$8 sps:$4 sm:$0xff]   ;;  %v4486_v48 = vld [vmem:[#allocation28 + $0x190] ss:$8 sps:$4 sm:$0xff]  }
 0x559   :  { %2865 = vmatpush1.bf16.msra.mxu1 %v4399_v46  ;;  %v4483_v46 = vld [vmem:[#allocation28 + $0x20] ss:$8 sps:$4 sm:$0xff]  }
 0x55a   :  { %2882 = vmatprep.mubr.bf16.mxu1 %v2443_v49  ;;  %2923 = vmatprep.mubr.bf16.mxu0 %v2443_v49  ;;  %v4489_v49 = vld [vmem:[#allocation28 + $0x10] ss:$8 sps:$4 sm:$0xff]  }
 0x55b   :  { %2924 = vmatmul.mubr.bf16.vlgmr.msra.gmra.mxu0 %v2442_v51  ;;  %2866 = vmatprep.subr.bf16.mxu1 %v4404_v24  ;;  %v4491_v24 = vld [vmem:[#allocation28 + $0x14] ss:$8 sps:$4 sm:$0xff]  }
 0x55c   :  { %3378 = vmatpush1.bf16.msra.mxu0 %v4426_v50  ;;  %v4494_v50 = vld [vmem:[#allocation28 + $0x184] ss:$8 sps:$4 sm:$0xff]  }
 0x55d   :  { %2867 = vmatpush2.bf16.msra.mxu1 %v4402_v52  ;;  %3379 = vmatprep.subr.bf16.mxu0 %v4431_v53  ;;  %v4497_v52 = vld [vmem:[#allocation28 + $0x4] ss:$8 sps:$4 sm:$0xff]   ;;  %v4495_v53 = vld [vmem:[#allocation28] ss:$8 sps:$4 sm:$0xff]  }
 0x55e   :  { %2868 = vmatprep.subr.bf16.mxu1 %v4407_v54  ;;  %v4500_v54 = vld [vmem:[#allocation28 + $0xf4] ss:$8 sps:$4 sm:$0xff]  }
 0x560   :  { %3380 = vmatpush1.bf16.msra.mxu0 %v4429_v55  ;;  %v4498_v55 = vld [vmem:[#allocation28 + $0xf0] ss:$8 sps:$4 sm:$0xff]  }
 0x561   :  { %2869 = vmatpush2.bf16.msra.mxu1 %v4405_v56  ;;  %3381 = vmatprep.subr.bf16.mxu0 %v4434_v57  ;;  %v4503_v56 = vld [vmem:[#allocation28 + $0xe4] ss:$8 sps:$4 sm:$0xff]   ;;  %v4501_v57 = vld [vmem:[#allocation28 + $0xe0] ss:$8 sps:$4 sm:$0xff]  }
 0x562   :  { %2870 = vmatprep.subr.bf16.mxu1 %v4410_v58  ;;  %v4506_v58 = vld [vmem:[#allocation28 + $0xd4] ss:$8 sps:$4 sm:$0xff]  }
 0x564   :  { %3382 = vmatpush1.bf16.msra.mxu0 %v4432_v59  ;;  %v4504_v59 = vld [vmem:[#allocation28 + $0xd0] ss:$8 sps:$4 sm:$0xff]  }
 0x565   :  { %2871 = vmatpush2.bf16.msra.mxu1 %v4408_v60  ;;  %3383 = vmatprep.subr.bf16.mxu0 %v4437_v61  ;;  %v4509_v60 = vld [vmem:[#allocation28 + $0xc4] ss:$8 sps:$4 sm:$0xff]   ;;  %v4507_v61 = vld [vmem:[#allocation28 + $0xc0] ss:$8 sps:$4 sm:$0xff]  }
 0x566   :  { %2872 = vmatprep.subr.bf16.mxu1 %v4413_v4  ;;  %v4512_v4 = vld [vmem:[#allocation28 + $0xb4] ss:$8 sps:$4 sm:$0xff]  }
 0x568   :  { %3384 = vmatpush1.bf16.msra.mxu0 %v4435_v62  ;;  %v4510_v62 = vld [vmem:[#allocation28 + $0xb0] ss:$8 sps:$4 sm:$0xff]  }
 0x569   :  { %2873 = vmatpush2.bf16.msra.mxu1 %v4411_v63  ;;  %3385 = vmatprep.subr.bf16.mxu0 %v4440_v0  ;;  %v4515_v63 = vld [vmem:[#allocation28 + $0xa4] ss:$8 sps:$4 sm:$0xff]   ;;  %v4513_v0 = vld [vmem:[#allocation28 + $0xa0] ss:$8 sps:$4 sm:$0xff]  }
 0x56a   :  { %2874 = vmatprep.subr.bf16.mxu1 %v4416_v1  ;;  %v4518_v1 = vld [vmem:[#allocation28 + $0x94] ss:$8 sps:$4 sm:$0xff]  }
 0x56c   :  { %3386 = vmatpush1.bf16.msra.mxu0 %v4438_v2  ;;  %v4516_v2 = vld [vmem:[#allocation28 + $0x90] ss:$8 sps:$4 sm:$0xff]  }
 0x56d   :  { %2875 = vmatpush2.bf16.msra.mxu1 %v4414_v3  ;;  %3387 = vmatprep.subr.bf16.mxu0 %v4443_v5  ;;  %v4521_v3 = vld [vmem:[#allocation28 + $0x84] ss:$8 sps:$4 sm:$0xff]   ;;  %v4519_v5 = vld [vmem:[#allocation28 + $0x80] ss:$8 sps:$4 sm:$0xff]  }
 0x56e   :  { %2876 = vmatprep.subr.bf16.mxu1 %v4419_v6  ;;  %v3704_v6 = vld [vmem:[#allocation22] ss:$0 sm:$0xff] }
 0x570   :  { %3388 = vmatpush1.bf16.msra.mxu0 %v4441_v10 }
 0x571   :  { %2877 = vmatpush2.bf16.msra.mxu1 %v4417_v14  ;;  %3389 = vmatprep.subr.bf16.mxu0 %v4446_v19 }
 0x572   :  { %2878 = vmatprep.subr.bf16.mxu1 %v4422_v15 }
 0x574   :  { %3390 = vmatpush1.bf16.msra.mxu0 %v4444_v20 }
 0x575   :  { %2879 = vmatpush2.bf16.msra.mxu1 %v4420_v16  ;;  %3391 = vmatprep.subr.bf16.mxu0 %v4449_v21 }
 0x576   :  { %2880 = vmatprep.subr.bf16.mxu1 %v4425_v17 }
 0x578   :  { %3392 = vmatpush1.bf16.msra.mxu0 %v4447_v22 }
 0x579   :  { %2881 = vmatpush2.bf16.msra.mxu1 %v4423_v18  ;;  %3393 = vmatprep.subr.bf16.mxu0 %v4452_v25  ;;  %v2508_v18 = vld [vmem:[%s5365_s22] sm:$0xf]  ;;  %s4959_s22 = smov [#allocation31]  }
 0x57a   :  { %3336 = vmatprep.subr.bf16.mxu1 %v4455_v27  ;;  %v2521_v19 = vrot.slane %v2508_v18, %v404_v9  ;;  %v2525_v20 = vrot.slane %v2508_v18, %v408_v12  ;;  %s3463_s3 = sshll.u32 %s4959_s22, 4  ;;  %s3464_s3 = int_to_ptr.vmem [resolvable:$true] %s3463_s3 }
 0x57b   :  { %s4890_s7 = scalar_lea.vmem %s3464_s3, 32  ;;  %p4895_p7 = scmp.lt.s32.totalorder %s3464_s3, %s3464_s3 }
 0x57c   :  { %2883 = vmatmul.mubr.bf16.vlgmr.msra.gmra.mxu1 %v2442_v51  ;;  %3394 = vmatpush2.bf16.msra.mxu0 %v4450_v23  ;;  %v4492_v51 = vld [vmem:[#allocation28 + $0x180] ss:$8 sps:$4 sm:$0xff]   ;;  %p4891_p6 = scmp.ne.s32.totalorder %s3464_s3, %s4890_s7  ;;  %p4896_p8 = scmp.lt.s32.totalorder %s4890_s7, %s4890_s7 }
 0x57d   :  { %3337 = vmatpush1.bf16.msra.mxu1 %v4453_v26  ;;  %3395 = vmatprep.subr.bf16.mxu0 %v4458_v28 }
 0x57e   :  { %3338 = vmatprep.subr.bf16.mxu1 %v4461_v29  ;;  %p4897_p9 = por %p4896_p8, %p4895_p7 }
 0x580   :  { %3396 = vmatpush2.bf16.msra.mxu0 %v4456_v30  ;;  %p4898_p10 = pnand %p4897_p9, %p4891_p6 }
 0x581   :  { %3339 = vmatpush1.bf16.msra.mxu1 %v4459_v31  ;;  %3397 = vmatprep.subr.bf16.mxu0 %v4464_v32  ;;  %v2513_v32 = vrot.slane %v2508_v18, %v5185_v8 }
 0x582   :  { %3340 = vmatprep.subr.bf16.mxu1 %v4467_v33  ;;  %v2517_v33 = vrot.slane %v2508_v18, %v5192_v11 }
 0x584   :  { %3398 = vmatpush2.bf16.msra.mxu0 %v4462_v34 }
 0x585   :  { %3341 = vmatpush1.bf16.msra.mxu1 %v4465_v13  ;;  %3399 = vmatprep.subr.bf16.mxu0 %v4470_v35 }
 0x586   :  { %3342 = vmatprep.subr.bf16.mxu1 %v4473_v36 }
 0x588   :  { %3400 = vmatpush2.bf16.msra.mxu0 %v4468_v37 }
 0x589   :  { %3343 = vmatpush1.bf16.msra.mxu1 %v4471_v38  ;;  %3401 = vmatprep.subr.bf16.mxu0 %v4476_v39 }
 0x58a   :  { %3344 = vmatprep.subr.bf16.mxu1 %v4479_v40 }
 0x58c   :  { %3402 = vmatpush2.bf16.msra.mxu0 %v4474_v41 }
 0x58d   :  { %3345 = vmatpush1.bf16.msra.mxu1 %v4477_v42  ;;  %3403 = vmatprep.subr.bf16.mxu0 %v4482_v43 }
 0x58e   :  { %3346 = vmatprep.subr.bf16.mxu1 %v4485_v44 }
 0x590   :  { %3404 = vmatpush2.bf16.msra.mxu0 %v4480_v45 }
 0x591   :  { %3347 = vmatpush1.bf16.msra.mxu1 %v4483_v46  ;;  %3405 = vmatprep.subr.bf16.mxu0 %v4488_v47 }
 0x592   :  { %3348 = vmatprep.subr.bf16.mxu1 %v4491_v24 }
 0x594   :  { %3406 = vmatpush2.bf16.msra.mxu0 %v4486_v48 }
 0x595   :  { %3349 = vmatpush1.bf16.msra.mxu1 %v4489_v49  ;;  %3407 = vmatprep.subr.bf16.mxu0 %v4494_v50 }
 0x596   :  { %3350 = vmatprep.subr.bf16.mxu1 %v4497_v52 }
 0x598   :  { %3408 = vmatpush2.bf16.msra.mxu0 %v4492_v51 }
 0x599   :  { %3351 = vmatpush1.bf16.msra.mxu1 %v4495_v53 }
 0x59a   :  { %3352 = vmatprep.subr.bf16.mxu1 %v4500_v54 }
 0x59d   :  { %3353 = vmatpush2.bf16.msra.mxu1 %v4498_v55 }
 0x59e   :  { %3354 = vmatprep.subr.bf16.mxu1 %v4503_v56 }
 0x5a1   :  { %3355 = vmatpush2.bf16.msra.mxu1 %v4501_v57 }
 0x5a2   :  { %3356 = vmatprep.subr.bf16.mxu1 %v4506_v58 }
 0x5a5   :  { %3357 = vmatpush2.bf16.msra.mxu1 %v4504_v59 }
 0x5a6   :  { %3358 = vmatprep.subr.bf16.mxu1 %v4509_v60 }
 0x5a9   :  { %3359 = vmatpush2.bf16.msra.mxu1 %v4507_v61 }
 0x5aa   :  { %3360 = vmatprep.subr.bf16.mxu1 %v4512_v4 }
 0x5ad   :  { %3361 = vmatpush2.bf16.msra.mxu1 %v4510_v62 }
 0x5ae   :  { %3362 = vmatprep.subr.bf16.mxu1 %v4515_v63 }
 0x5b1   :  { %3363 = vmatpush2.bf16.msra.mxu1 %v4513_v0 }
 0x5b2   :  { %3364 = vmatprep.subr.bf16.mxu1 %v4518_v1 }
 0x5b5   :  { %3365 = vmatpush2.bf16.msra.mxu1 %v4516_v2 }
 0x5b6   :  { %3366 = vmatprep.subr.bf16.mxu1 %v4521_v3 }
 0x5b9   :  { %3367 = vmatpush2.bf16.msra.mxu1 %v4519_v5 }
 0x5fc   :  { %v2285_v10 = vpop.f32.mrf.mxu1 }
 0x5fd   :  { %v2286_v14 = vadd.f32 %v3704_v6, %v2285_v10 }
 0x5fe   :  { %v3966_v15 = vpop.f32.mrf.mxu1 }
 0x5ff   :  { %3442 = vst [vmem:[#allocation31] sm:$0x3] %v2286_v14 }
 0x600   :  { %v2288_v16 = vpop.f32.mrf.mxu1 }
 0x602   :  { %v3967_v17 = vpop.f32.mrf.mxu1 }
 0x61b   :  { %v2925_v21 = vpop.f32.mrf.mxu0 }
 0x61c   :  { %v2926_v22 = vadd.f32 %v2925_v21, %v2521_v19 }
 0x61d   :  { %v2927_v23 = vpop.f32.mrf.mxu0 }
 0x61e   :  { %v2928_v25 = vadd.f32 %v2927_v23, %v2525_v20  ;;  %v2934_v26 = vmax.f32 %v2926_v22, 0.0 }
 0x61f   :  { %v2929_v27 = vpop.f32.mrf.mxu0 }
 0x620   :  { %v2935_v28 = vmax.f32 %v2928_v25, 0.0  ;;  %v2938_v31 = vpack.c.bf16 %v2934_v26, %v2934_v26 }
 0x621   :  { %v2930_v29 = vpop.f32.mrf.mxu0 }
 0x622   :  { %v2939_v30 = vpack.c.bf16 %v2935_v28, %v2935_v28 }
 0x624   :  { %3409 = vmatprep.mubr.bf16.mxu0 %v2939_v30 }
 0x625   :  { %3410 = vmatmul.mubr.bf16.vlgmr.msra.gmra.mxu0 %v2938_v31 }
 0x63c   :  { %v2884_v9 = vpop.f32.mrf.mxu1 }
 0x63d   :  { %v2885_v34 = vadd.f32 %v2884_v9, %v2513_v32 }
 0x63e   :  { %v2886_v7 = vpop.f32.mrf.mxu1 }
 0x63f   :  { %v2887_v12 = vadd.f32 %v2886_v7, %v2517_v33  ;;  %v2932_v13 = vmax.f32 %v2885_v34, 0.0 }
 0x640   :  { %v2888_v35 = vpop.f32.mrf.mxu1 }
 0x641   :  { %v2933_v36 = vmax.f32 %v2887_v12, 0.0  ;;  %v2936_v39 = vpack.c.bf16 %v2932_v13, %v2932_v13 }
 0x642   :  { %v2889_v37 = vpop.f32.mrf.mxu1 }
 0x643   :  { %v2937_v38 = vpack.c.bf16 %v2933_v36, %v2933_v36 }
 0x645   :  { %3368 = vmatprep.mubr.bf16.mxu1 %v2937_v38 }
 0x646   :  { %3369 = vmatmul.mubr.bf16.vlgmr.msra.gmra.mxu1 %v2936_v39 }
 0x647   :  { %4901 = shalt.err (!%p4898_p10)
}
 0x648   :  { %3466 = dma.vmem_to_hbm [thread:$0]  %s3464_s3, 32, %s5369_s26, [#allocation4]   ;;  %v3004_v44 = vld [vmem:[#allocation29] sm:$0x3] }
 0x649   :  { %v3009_v45 = vrot.slane %v3004_v44, %v5185_v8  ;;  %v3013_v46 = vrot.slane %v3004_v44, %v5192_v11 }
 0x6e5   :  { %v3411_v40 = vpop.f32.mrf.mxu0 }
 0x6e7   :  { %v3413_v41 = vpop.f32.mrf.mxu0 }
 0x6e9   :  { %v3415_v42 = vpop.f32.mrf.mxu0 }
 0x6eb   :  { %v3416_v43 = vpop.f32.mrf.mxu0 }
 0x706   :  { %v3370_v47 = vpop.f32.mrf.mxu1 }
 0x707   :  { %v3371_v48 = vadd.f32 %v3370_v47, %v3009_v45 }
 0x708   :  { %v3372_v24 = vpop.f32.mrf.mxu1 }
 0x709   :  { %v3412_v49 = vadd.f32 %v3411_v40, %v3371_v48  ;;  %v3373_v50 = vadd.f32 %v3372_v24, %v3013_v46 }
 0x70a   :  { %v3374_v51 = vpop.f32.mrf.mxu1 }
 0x70b   :  { %v3418_v52 = vsub.f32 0.0, %v3412_v49  ;;  %v3414_v53 = vadd.f32 %v3413_v41, %v3373_v50 }
 0x70c   :  { %v3375_v54 = vpop.f32.mrf.mxu1 }
 0x70d   :  { %v3420_v55 = vmul.f32 1.442695, %v3418_v52  ;;  %v3419_v56 = vsub.f32 0.0, %v3414_v53 }
 0x70f   :  { %4522 = vpow2.f32 %v3420_v55  ;;  %v3422_v57 = vmul.f32 1.442695, %v3419_v56 }
 0x711   :  { %4524 = vpow2.f32 %v3422_v57 }
 0x71c   :  { %v4523_v58 = vpop.eup %4522 }
 0x71d   :  { %v3424_v59 = vadd.f32 1.0, %v4523_v58 }
 0x71e   :  { %v4525_v60 = vpop.eup %4524 }
 0x71f   :  { %v3425_v8 = vadd.f32 1.0, %v4525_v60  ;;  %4526 = vrcp.f32 %v3424_v59 }
 0x721   :  { %4528 = vrcp.f32 %v3425_v8 }
 0x72c   :  { %v4527_v11 = vpop.eup %4526 }
 0x72e   :  { %v4529_v61 = vpop.eup %4528 }
 0x72f   :  { %v3432_v4 = vcombine.low %v4527_v11, %v4529_v61 }
 0x731   :  { %3857 = vst.sshfl [vmem:[%s5368_s25] sm:$0x33 pattern:$0x76325410] %v3432_v4 }
 0x732   :  { %4930 = dma.done.wait [#allocation4], 32  }
 0x733   :  { %4931 = vsyncadd [#allocation4], 4294967264 }
 0x734   :  { %3476 = vsyncpa [#allocation3], 1 }
 0x735   :  { %3477 = vsyncpa [#allocation6], 1 }
 0x736   :  { %3478 = vsyncpa [#allocation9], 1 }
 0x737   :  { %3479 = vsyncpa [#allocation12], 1 }
 0x738   :  { %3480 = vsyncpa [#allocation15], 1 }
 0x739   :  { %3481 = vsyncpa [#allocation18], 1 }
 0x73a   :  { %3482 = vsyncpa [#allocation21], 1 }
 0x73b   :  { %3483 = vsyncpa [#allocation24], 1 }
 0x73c   :  { %3484 = vsyncpa [#allocation27], 1 }
 0x73d   :  { %3485 = vsyncpa [#allocation30], 1 }
 0x73e   :  { %3486 = vsyncpa [#allocation4], 1 }

</bundles_post_ra>
